<compile_context>
chip_gen: v7x
topology: tpu7x:2x2x1
jax: 0.10.0
libtpu: 0.0.40
codegen_flags: <defaults>
</compile_context>

<pallas_src>
import math
from functools import partial

import jax
import jax.numpy as jnp
from jax.experimental import pallas as pl
from jax.experimental.pallas import tpu as pltpu

_INV_SQRT2 = 1.0 / math.sqrt(2.0)


def _gelu(x):
    # exact (erf-based) GELU, matching torch.nn.GELU() default
    return 0.5 * x * (1.0 + jax.lax.erf(x * _INV_SQRT2))


# ----------------------------------------------------------------------------
# Kernel
# ----------------------------------------------------------------------------
def _down_kernel(xp_ref, w1_ref, sh1_ref, w2_ref, sh2_ref,
                 wse1_ref, wse2_ref, wres_ref, bres_ref,
                 out_ref, h1pad_scr):
    bt, hp2, k1 = xp_ref.shape          # k1 = w*cin
    h = hp2 - 2
    n1 = w1_ref.shape[-1]               # w*cmid
    n2 = w2_ref.shape[-1]               # w*cout
    m = bt * h

    # Input block: rows 0 and h+1 are already zero (padded in the XLA prologue).
    xp = xp_ref[...]                                     # (bt, h+2, w*cin) f32
    xs = [xp[:, dy:dy + h, :].reshape(m, k1).astype(jnp.bfloat16)
          for dy in range(3)]

    # ---- conv1 (+BN1 folded): 3 dy-banded matmuls, bf16 operands, f32 acc ----
    acc1 = jnp.zeros((m, n1), jnp.float32)
    for dy in range(3):
        acc1 = acc1 + jnp.dot(xs[dy], w1_ref[dy],
                              preferred_element_type=jnp.float32)
    h1 = _gelu(acc1 + sh1_ref[...])                      # (m, n1) f32

    # ---- row-pad conv1 activation (2 full-width zero-row stores + interior) --
    h1pad_scr[:, 0:1, :] = jnp.zeros((bt, 1, n1), jnp.float32)
    h1pad_scr[:, h + 1:h + 2, :] = jnp.zeros((bt, 1, n1), jnp.float32)
    h1pad_scr[:, 1:h + 1, :] = h1.reshape(bt, h, n1)
    h1p = h1pad_scr[...]                                 # (bt, h+2, n1)
    h1s = [h1p[:, dy:dy + h, :].reshape(m, n1).astype(jnp.bfloat16)
           for dy in range(3)]

    # ---- conv2 (+BN2 folded) ----
    acc2 = jnp.zeros((m, n2), jnp.float32)
    for dy in range(3):
        acc2 = acc2 + jnp.dot(h1s[dy], w2_ref[dy],
                              preferred_element_type=jnp.float32)
    h2 = (acc2 + sh2_ref[...]).reshape(bt, h, n2)        # (bt, h, w*cout)

    # ---- SE gate: spatial mean folded into wse1; fc2 pre-tiled across x ----
    row_sum = jnp.sum(h2, axis=1)                        # (bt, w*cout)
    z = _gelu(jnp.dot(row_sum, wse1_ref[...],
                      preferred_element_type=jnp.float32))      # (bt, cr)
    gate = jax.nn.sigmoid(jnp.dot(z, wse2_ref[...],
                                  preferred_element_type=jnp.float32))  # (bt, w*cout)
    h2g = h2 * gate[:, None, :]

    # ---- residual 1x1 conv: block-diagonal banded weight; reuse dy=1 slice ----
    res = jnp.dot(xs[1], wres_ref[...],
                  preferred_element_type=jnp.float32) + bres_ref[...]
    out = _gelu(h2g + res.reshape(bt, h, n2))
    out_ref[...] = out.astype(out_ref.dtype)             # lane-dense (256) store


# ----------------------------------------------------------------------------
# Wrapper: weight pre-expansion + pallas_call
# ----------------------------------------------------------------------------
def _band_weights(wgt, scale, w):
    """(3,3,Ci,Co) HWIO conv weight (BN scale folded) -> (3, w*Ci, w*Co) banded."""
    ci, co = wgt.shape[2], wgt.shape[3]
    wf = wgt * scale.reshape(1, 1, 1, co)
    xi = jnp.arange(w)[:, None, None]
    dx = jnp.arange(3)[None, :, None]
    xo = jnp.arange(w)[None, None, :]
    sel = (xi == xo + dx - 1).astype(wgt.dtype)          # (w, 3, w): dx tap map
    band = jnp.einsum('ido,ydcq->yicoq', sel, wf)        # (3, w, ci, w, co)
    return band.reshape(3, w * ci, w * co)


def _prepare_params(params, h, w):
    (w1, b1, s1, t1, w2, b2, s2, t2, wfc1, wfc2, wres, bres) = params
    cin, cmid = w1.shape[2], w1.shape[3]
    cout = w2.shape[3]

    w1b = _band_weights(w1, s1, w).astype(jnp.bfloat16)          # (3, w*cin,  w*cmid)
    w2b = _band_weights(w2, s2, w).astype(jnp.bfloat16)          # (3, w*cmid, w*cout)
    sh1 = jnp.tile(b1 * s1 + t1, (1, w))                         # (1, w*cmid)
    sh2 = jnp.tile(b2 * s2 + t2, (1, w))                         # (1, w*cout)
    wse1 = jnp.tile(wfc1.T, (w, 1)) / float(h * w)               # (w*cout, cr) mean folded
    wse2 = jnp.tile(wfc2, (1, w))                                # (cr, w*cout)
    eye = jnp.eye(w, dtype=wres.dtype)
    wresb = jnp.einsum('io,cq->icoq', eye, wres).reshape(
        w * cin, w * cout).astype(jnp.bfloat16)                  # block-diag 1x1 conv
    brest = jnp.tile(bres, (1, w))                               # (1, w*cout)
    return w1b, sh1, w2b, sh2, wse1, wse2, wresb, brest


def _pick_bt(b, batch_tile):
    if batch_tile is not None:
        assert b % batch_tile == 0
        return batch_tile
    # grid >= 2 whenever b >= 2 (v7x megacore), cap bt at 32 (amortize per-step
    # overhead for large batches).
    bt = min(max(b // 2, 1), 32)
    while b % bt != 0:
        bt -= 1
    return max(bt, 1)


def down_forward(x_nchw, params, *, batch_tile=None):
    """Down.forward: MaxPool2d(2) then ResidualBlock.
    x_nchw: (B, Cin, H, W) f32 -> (B, Cout, H//2, W//2) f32."""
    b, cin, hh, ww = x_nchw.shape
    assert hh % 2 == 0 and ww % 2 == 0
    h, w = hh // 2, ww // 2
    cmid = params[0].shape[3]
    cout = params[4].shape[3]

    bt = _pick_bt(b, batch_tile)

    # Prologue (fuses into ~one XLA pass over the input): NCHW->NHWC, 2x2/stride-2
    # maxpool, pack rows lane-dense as (b, h, w*cin), zero-pad the dy border rows.
    xt = jnp.transpose(x_nchw, (0, 2, 3, 1)).astype(jnp.float32)
    xp = jnp.max(xt.reshape(b, h, 2, w, 2, cin), axis=(2, 4))     # (b, h, w, cin)
    xp = jnp.pad(xp.reshape(b, h, w * cin), ((0, 0), (1, 1), (0, 0)))

    w1b, sh1, w2b, sh2, wse1, wse2, wresb, brest = _prepare_params(params, h, w)

    def _full(arr):
        n = arr.ndim
        return pl.BlockSpec(arr.shape, lambda i, _n=n: (0,) * _n)

    grid_spec = pltpu.PrefetchScalarGridSpec(
        num_scalar_prefetch=0,
        grid=(b // bt,),
        in_specs=[
            pl.BlockSpec((bt, h + 2, w * cin), lambda i: (i, 0, 0)),
            _full(w1b), _full(sh1), _full(w2b), _full(sh2),
            _full(wse1), _full(wse2), _full(wresb), _full(brest),
        ],
        out_specs=pl.BlockSpec((bt, h, w * cout), lambda i: (i, 0, 0)),
        scratch_shapes=[pltpu.VMEM((bt, h + 2, w * cmid), jnp.float32)],
    )

    out_rows = pl.pallas_call(
        _down_kernel,
        out_shape=jax.ShapeDtypeStruct((b, h, w * cout), jnp.float32),
        grid_spec=grid_spec,
        compiler_params=pltpu.CompilerParams(
            dimension_semantics=("parallel",)),
    )(xp, w1b, sh1, w2b, sh2, wse1, wse2, wresb, brest)

    # TODO(synk): the maxpool/transpose prologue and the NHWC->NCHW epilogue stay
    # in XLA (each fuses to a single HBM pass); fusing them in-kernel would need
    # lane<->sublane relayouts that lower poorly at C=16/32.
    out = out_rows.reshape(b, h, w, cout)
    return jnp.transpose(out, (0, 3, 1, 2))


# ----------------------------------------------------------------------------
# Pure-JAX reference + parameter construction (for the correctness check)
# ----------------------------------------------------------------------------
def _reference_forward(x_nchw, params):
    (w1, b1, s1, t1, w2, b2, s2, t2, wfc1, wfc2, wres, bres) = params
    b, cin, hh, ww = x_nchw.shape
    h, w = hh // 2, ww // 2
    x = jnp.transpose(x_nchw, (0, 2, 3, 1)).astype(jnp.float32)
    x = jnp.max(x.reshape(b, h, 2, w, 2, cin), axis=(2, 4))       # maxpool 2x2

    def conv3x3(inp, wgt, bias):
        y = jax.lax.conv_general_dilated(
            inp, wgt, (1, 1), 'SAME',
            dimension_numbers=('NHWC', 'HWIO', 'NHWC'))
        return y + bias.reshape(1, 1, 1, -1)

    h1 = conv3x3(x, w1, b1) * s1.reshape(1, 1, 1, -1) + t1.reshape(1, 1, 1, -1)
    h1 = _gelu(h1)
    h2 = conv3x3(h1, w2, b2) * s2.reshape(1, 1, 1, -1) + t2.reshape(1, 1, 1, -1)
    pooled = jnp.mean(h2, axis=(1, 2))                   # (B, Cout)
    z = _gelu(pooled @ wfc1.T)                           # fc1 (torch weight layout)
    gate = jax.nn.sigmoid(z @ wfc2)                      # fc2 (stored as torch W.T)
    h2 = h2 * gate[:, None, None, :]
    res = jnp.einsum('bhwc,co->bhwo', x, wres) + bres.reshape(1, 1, 1, -1)
    out = _gelu(h2 + res)
    return jnp.transpose(out, (0, 3, 1, 2))


def _make_params(key, cin, cout, cmid=None, reduction=16, eps=1e-5):
    cmid = cmid or cout
    cr = cout // reduction
    ks = jax.random.split(key, 16)

    # conv weights in HWIO (3,3,Ci,Co); equals torch OIHW weight transposed (2,3,1,0).
    w1 = 0.1 * jax.random.normal(ks[0], (3, 3, cin, cmid), jnp.float32)
    b1 = 0.1 * jax.random.normal(ks[1], (1, cmid), jnp.float32)
    w2 = 0.1 * jax.random.normal(ks[2], (3, 3, cmid, cout), jnp.float32)
    b2 = 0.1 * jax.random.normal(ks[3], (1, cout), jnp.float32)

    # BatchNorm (inference mode) folded to per-channel scale/shift.
    g1 = 1.0 + 0.1 * jax.random.normal(ks[4], (1, cmid), jnp.float32)
    be1 = 0.1 * jax.random.normal(ks[5], (1, cmid), jnp.float32)
    m1 = 0.1 * jax.random.normal(ks[6], (1, cmid), jnp.float32)
    v1 = 0.5 + jax.random.uniform(ks[7], (1, cmid), jnp.float32)
    s1 = g1 / jnp.sqrt(v1 + eps)
    t1 = be1 - m1 * s1

    g2 = 1.0 + 0.1 * jax.random.normal(ks[8], (1, cout), jnp.float32)
    be2 = 0.1 * jax.random.normal(ks[9], (1, cout), jnp.float32)
    m2 = 0.1 * jax.random.normal(ks[10], (1, cout), jnp.float32)
    v2 = 0.5 + jax.random.uniform(ks[11], (1, cout), jnp.float32)
    s2 = g2 / jnp.sqrt(v2 + eps)
    t2 = be2 - m2 * s2

    # SE linears (no bias): wfc1 == torch fc1.weight (Cr, C); wfc2 == torch fc2.weight.T (Cr, C).
    wfc1 = 0.2 * jax.random.normal(ks[12], (cr, cout), jnp.float32)
    wfc2 = 0.2 * jax.random.normal(ks[13], (cr, cout), jnp.float32)

    # 1x1 reshape conv (in_channels != out_channels) with bias: (Cin, Cout).
    wres = 0.1 * jax.random.normal(ks[14], (cin, cout), jnp.float32)
    bres = 0.1 * jax.random.normal(ks[15], (1, cout), jnp.float32)

    return (w1, b1, s1, t1, w2, b2, s2, t2, wfc1, wfc2, wres, bres)


if __name__ == "__main__":
    # Down(16, 32): maxpool(2) then ResidualBlock(16 -> 32), num_blocks=1.
    CIN, COUT, H, W = 16, 32, 16, 16
    key = jax.random.PRNGKey(0)
    kx, kp, kx2 = jax.random.split(key, 3)
    params = _make_params(kp, CIN, COUT, COUT)
    fwd = jax.jit(partial(down_forward, params=params))

    # Case 1: B=2 (bt=1 -> grid of 2, exercises the multi-core grid path).
    x = jax.random.normal(kx, (2, CIN, H, W), jnp.float32)        # NCHW like PyTorch
    out = jax.block_until_ready(fwd(x))
    assert out.shape == (2, COUT, H // 2, W // 2)
    ref = _reference_forward(x, params)
    err = float(jnp.max(jnp.abs(out - ref)))
    # bf16 MXU operands (f32 accumulation) vs. the pure-f32 reference.
    assert jnp.allclose(out, ref, rtol=5e-2, atol=5e-2), err

    # Case 2: B=8 (bt=4 -> grid of 2, exercises the batched matmul path).
    x2 = jax.random.normal(kx2, (8, CIN, H, W), jnp.float32)
    out2 = jax.block_until_ready(fwd(x2))
    ref2 = _reference_forward(x2, params)
    err2 = float(jnp.max(jnp.abs(out2 - ref2)))
    assert jnp.allclose(out2, ref2, rtol=5e-2, atol=5e-2), err2

    print("KERNEL_OK")
</pallas_src>

<mosaic_0001>
module attributes {stable_mosaic.version = 11 : i64} {
  func.func @_down_kernel(%arg0: i32, %arg1: memref<1x10x128xf32, #tpu.memory_space<vmem>>, %arg2: memref<3x128x256xbf16, #tpu.memory_space<vmem>>, %arg3: memref<1x256xf32, #tpu.memory_space<vmem>>, %arg4: memref<3x256x256xbf16, #tpu.memory_space<vmem>>, %arg5: memref<1x256xf32, #tpu.memory_space<vmem>>, %arg6: memref<256x2xf32, #tpu.memory_space<vmem>>, %arg7: memref<2x256xf32, #tpu.memory_space<vmem>>, %arg8: memref<128x256xbf16, #tpu.memory_space<vmem>>, %arg9: memref<1x256xf32, #tpu.memory_space<vmem>>, %arg10: memref<1x8x256xf32, #tpu.memory_space<vmem>>, %arg11: memref<1x10x256xf32, #tpu.memory_space<vmem>>) attributes {dimension_semantics = [#tpu.dimension_semantics<parallel>], iteration_bounds = array<i64: 2>, scalar_prefetch = 0 : i64, scratch_operands = 1 : i64, tpu.core_type = #tpu.core_type<tc>, window_params = [{transform_indices = @transform_0, window_bounds = array<i64: 1, 10, 128>}, {pipeline_mode = #tpu.pipeline_mode<synchronous>, transform_indices = @transform_1, window_bounds = array<i64: 3, 128, 256>}, {pipeline_mode = #tpu.pipeline_mode<synchronous>, transform_indices = @transform_2, window_bounds = array<i64: 1, 256>}, {pipeline_mode = #tpu.pipeline_mode<synchronous>, transform_indices = @transform_3, window_bounds = array<i64: 3, 256, 256>}, {pipeline_mode = #tpu.pipeline_mode<synchronous>, transform_indices = @transform_4, window_bounds = array<i64: 1, 256>}, {pipeline_mode = #tpu.pipeline_mode<synchronous>, transform_indices = @transform_5, window_bounds = array<i64: 256, 2>}, {pipeline_mode = #tpu.pipeline_mode<synchronous>, transform_indices = @transform_6, window_bounds = array<i64: 2, 256>}, {pipeline_mode = #tpu.pipeline_mode<synchronous>, transform_indices = @transform_7, window_bounds = array<i64: 128, 256>}, {pipeline_mode = #tpu.pipeline_mode<synchronous>, transform_indices = @transform_8, window_bounds = array<i64: 1, 256>}, {transform_indices = @transform_9, window_bounds = array<i64: 1, 8, 256>}]} {
    %c0 = arith.constant 0 : index
    %c0_0 = arith.constant 0 : index
    %c0_1 = arith.constant 0 : index
    %0 = vector.load %arg1[%c0, %c0_0, %c0_1] : memref<1x10x128xf32, #tpu.memory_space<vmem>>, vector<1x10x128xf32>
    %1 = vector.extract_strided_slice %0 {offsets = [0, 0, 0], sizes = [1, 8, 128], strides = [1, 1, 1]} : vector<1x10x128xf32> to vector<1x8x128xf32>
    %2 = vector.shape_cast %1 : vector<1x8x128xf32> to vector<8x128xf32>
    %3 = arith.truncf %2 : vector<8x128xf32> to vector<8x128xbf16>
    %4 = vector.extract_strided_slice %0 {offsets = [0, 1, 0], sizes = [1, 8, 128], strides = [1, 1, 1]} : vector<1x10x128xf32> to vector<1x8x128xf32>
    %5 = vector.shape_cast %4 : vector<1x8x128xf32> to vector<8x128xf32>
    %6 = arith.truncf %5 : vector<8x128xf32> to vector<8x128xbf16>
    %7 = vector.extract_strided_slice %0 {offsets = [0, 2, 0], sizes = [1, 8, 128], strides = [1, 1, 1]} : vector<1x10x128xf32> to vector<1x8x128xf32>
    %8 = vector.shape_cast %7 : vector<1x8x128xf32> to vector<8x128xf32>
    %9 = arith.truncf %8 : vector<8x128xf32> to vector<8x128xbf16>
    %cst = arith.constant 0.000000e+00 : f32
    %10 = vector.broadcast %cst : f32 to vector<8x256xf32>
    %c0_2 = arith.constant 0 : index
    %c0_3 = arith.constant 0 : index
    %c0_4 = arith.constant 0 : index
    %11 = vector.load %arg2[%c0_2, %c0_3, %c0_4] : memref<3x128x256xbf16, #tpu.memory_space<vmem>>, vector<1x128x256xbf16>
    %12 = vector.shape_cast %11 : vector<1x128x256xbf16> to vector<128x256xbf16>
    %cst_5 = arith.constant dense<0.000000e+00> : vector<8x256xf32>
    %13 = tpu.matmul %3, %12, %cst_5 {dimension_numbers = #tpu.dot_dimension_numbers<[1], [0], [0], [1], [0, 0, 1, 1], [], []>} : vector<8x128xbf16>, vector<128x256xbf16>, vector<8x256xf32> -> vector<8x256xf32>
    %14 = arith.addf %10, %13 : vector<8x256xf32>
    %c1 = arith.constant 1 : index
    %c0_6 = arith.constant 0 : index
    %c0_7 = arith.constant 0 : index
    %15 = vector.load %arg2[%c1, %c0_6, %c0_7] : memref<3x128x256xbf16, #tpu.memory_space<vmem>>, vector<1x128x256xbf16>
    %16 = vector.shape_cast %15 : vector<1x128x256xbf16> to vector<128x256xbf16>
    %cst_8 = arith.constant dense<0.000000e+00> : vector<8x256xf32>
    %17 = tpu.matmul %6, %16, %cst_8 {dimension_numbers = #tpu.dot_dimension_numbers<[1], [0], [0], [1], [0, 0, 1, 1], [], []>} : vector<8x128xbf16>, vector<128x256xbf16>, vector<8x256xf32> -> vector<8x256xf32>
    %18 = arith.addf %14, %17 : vector<8x256xf32>
    %c2 = arith.constant 2 : index
    %c0_9 = arith.constant 0 : index
    %c0_10 = arith.constant 0 : index
    %19 = vector.load %arg2[%c2, %c0_9, %c0_10] : memref<3x128x256xbf16, #tpu.memory_space<vmem>>, vector<1x128x256xbf16>
    %20 = vector.shape_cast %19 : vector<1x128x256xbf16> to vector<128x256xbf16>
    %cst_11 = arith.constant dense<0.000000e+00> : vector<8x256xf32>
    %21 = tpu.matmul %9, %20, %cst_11 {dimension_numbers = #tpu.dot_dimension_numbers<[1], [0], [0], [1], [0, 0, 1, 1], [], []>} : vector<8x128xbf16>, vector<128x256xbf16>, vector<8x256xf32> -> vector<8x256xf32>
    %22 = arith.addf %18, %21 : vector<8x256xf32>
    %c0_12 = arith.constant 0 : index
    %c0_13 = arith.constant 0 : index
    %23 = vector.load %arg3[%c0_12, %c0_13] : memref<1x256xf32, #tpu.memory_space<vmem>>, vector<1x256xf32>
    %24 = vector.broadcast %23 : vector<1x256xf32> to vector<8x256xf32>
    %25 = arith.addf %22, %24 : vector<8x256xf32>
    %cst_14 = arith.constant 5.000000e-01 : f32
    %26 = vector.broadcast %cst_14 : f32 to vector<8x256xf32>
    %27 = arith.mulf %26, %25 : vector<8x256xf32>
    %cst_15 = arith.constant 0.707106769 : f32
    %28 = vector.broadcast %cst_15 : f32 to vector<8x256xf32>
    %29 = arith.mulf %25, %28 : vector<8x256xf32>
    %30 = math.erf %29 : vector<8x256xf32>
    %cst_16 = arith.constant 1.000000e+00 : f32
    %31 = vector.broadcast %cst_16 : f32 to vector<8x256xf32>
    %32 = arith.addf %31, %30 : vector<8x256xf32>
    %33 = arith.mulf %27, %32 : vector<8x256xf32>
    %cst_17 = arith.constant 0.000000e+00 : f32
    %34 = vector.broadcast %cst_17 : f32 to vector<1x1x256xf32>
    %c0_18 = arith.constant 0 : index
    %c0_19 = arith.constant 0 : index
    %c0_20 = arith.constant 0 : index
    %35 = vector.load %arg11[%c0_18, %c0_19, %c0_20] : memref<1x10x256xf32, #tpu.memory_space<vmem>>, vector<1x1x256xf32>
    tpu.vector_store %arg11[%c0_18, %c0_19, %c0_20], %34 {strides = array<i32>} : memref<1x10x256xf32, #tpu.memory_space<vmem>>, vector<1x1x256xf32>,
    %cst_21 = arith.constant 0.000000e+00 : f32
    %36 = vector.broadcast %cst_21 : f32 to vector<1x1x256xf32>
    %c0_22 = arith.constant 0 : index
    %c9 = arith.constant 9 : index
    %c0_23 = arith.constant 0 : index
    %37 = vector.load %arg11[%c0_22, %c9, %c0_23] : memref<1x10x256xf32, #tpu.memory_space<vmem>>, vector<1x1x256xf32>
    tpu.vector_store %arg11[%c0_22, %c9, %c0_23], %36 {strides = array<i32>} : memref<1x10x256xf32, #tpu.memory_space<vmem>>, vector<1x1x256xf32>,
    %38 = vector.shape_cast %33 : vector<8x256xf32> to vector<1x8x256xf32>
    %c0_24 = arith.constant 0 : index
    %c1_25 = arith.constant 1 : index
    %c0_26 = arith.constant 0 : index
    %39 = vector.load %arg11[%c0_24, %c1_25, %c0_26] : memref<1x10x256xf32, #tpu.memory_space<vmem>>, vector<1x8x256xf32>
    tpu.vector_store %arg11[%c0_24, %c1_25, %c0_26], %38 {strides = array<i32>} : memref<1x10x256xf32, #tpu.memory_space<vmem>>, vector<1x8x256xf32>,
    %c0_27 = arith.constant 0 : index
    %c0_28 = arith.constant 0 : index
    %c0_29 = arith.constant 0 : index
    %40 = vector.load %arg11[%c0_27, %c0_28, %c0_29] : memref<1x10x256xf32, #tpu.memory_space<vmem>>, vector<1x10x256xf32>
    %41 = vector.extract_strided_slice %40 {offsets = [0, 0, 0], sizes = [1, 8, 256], strides = [1, 1, 1]} : vector<1x10x256xf32> to vector<1x8x256xf32>
    %42 = vector.shape_cast %41 : vector<1x8x256xf32> to vector<8x256xf32>
    %43 = arith.truncf %42 : vector<8x256xf32> to vector<8x256xbf16>
    %44 = vector.extract_strided_slice %40 {offsets = [0, 1, 0], sizes = [1, 8, 256], strides = [1, 1, 1]} : vector<1x10x256xf32> to vector<1x8x256xf32>
    %45 = vector.shape_cast %44 : vector<1x8x256xf32> to vector<8x256xf32>
    %46 = arith.truncf %45 : vector<8x256xf32> to vector<8x256xbf16>
    %47 = vector.extract_strided_slice %40 {offsets = [0, 2, 0], sizes = [1, 8, 256], strides = [1, 1, 1]} : vector<1x10x256xf32> to vector<1x8x256xf32>
    %48 = vector.shape_cast %47 : vector<1x8x256xf32> to vector<8x256xf32>
    %49 = arith.truncf %48 : vector<8x256xf32> to vector<8x256xbf16>
    %cst_30 = arith.constant 0.000000e+00 : f32
    %50 = vector.broadcast %cst_30 : f32 to vector<8x256xf32>
    %c0_31 = arith.constant 0 : index
    %c0_32 = arith.constant 0 : index
    %c0_33 = arith.constant 0 : index
    %51 = vector.load %arg4[%c0_31, %c0_32, %c0_33] : memref<3x256x256xbf16, #tpu.memory_space<vmem>>, vector<1x256x256xbf16>
    %52 = vector.shape_cast %51 : vector<1x256x256xbf16> to vector<256x256xbf16>
    %cst_34 = arith.constant dense<0.000000e+00> : vector<8x256xf32>
    %53 = tpu.matmul %43, %52, %cst_34 {dimension_numbers = #tpu.dot_dimension_numbers<[1], [0], [0], [1], [0, 0, 1, 1], [], []>} : vector<8x256xbf16>, vector<256x256xbf16>, vector<8x256xf32> -> vector<8x256xf32>
    %54 = arith.addf %50, %53 : vector<8x256xf32>
    %c1_35 = arith.constant 1 : index
    %c0_36 = arith.constant 0 : index
    %c0_37 = arith.constant 0 : index
    %55 = vector.load %arg4[%c1_35, %c0_36, %c0_37] : memref<3x256x256xbf16, #tpu.memory_space<vmem>>, vector<1x256x256xbf16>
    %56 = vector.shape_cast %55 : vector<1x256x256xbf16> to vector<256x256xbf16>
    %cst_38 = arith.constant dense<0.000000e+00> : vector<8x256xf32>
    %57 = tpu.matmul %46, %56, %cst_38 {dimension_numbers = #tpu.dot_dimension_numbers<[1], [0], [0], [1], [0, 0, 1, 1], [], []>} : vector<8x256xbf16>, vector<256x256xbf16>, vector<8x256xf32> -> vector<8x256xf32>
    %58 = arith.addf %54, %57 : vector<8x256xf32>
    %c2_39 = arith.constant 2 : index
    %c0_40 = arith.constant 0 : index
    %c0_41 = arith.constant 0 : index
    %59 = vector.load %arg4[%c2_39, %c0_40, %c0_41] : memref<3x256x256xbf16, #tpu.memory_space<vmem>>, vector<1x256x256xbf16>
    %60 = vector.shape_cast %59 : vector<1x256x256xbf16> to vector<256x256xbf16>
    %cst_42 = arith.constant dense<0.000000e+00> : vector<8x256xf32>
    %61 = tpu.matmul %49, %60, %cst_42 {dimension_numbers = #tpu.dot_dimension_numbers<[1], [0], [0], [1], [0, 0, 1, 1], [], []>} : vector<8x256xbf16>, vector<256x256xbf16>, vector<8x256xf32> -> vector<8x256xf32>
    %62 = arith.addf %58, %61 : vector<8x256xf32>
    %c0_43 = arith.constant 0 : index
    %c0_44 = arith.constant 0 : index
    %63 = vector.load %arg5[%c0_43, %c0_44] : memref<1x256xf32, #tpu.memory_space<vmem>>, vector<1x256xf32>
    %64 = vector.broadcast %63 : vector<1x256xf32> to vector<8x256xf32>
    %65 = arith.addf %62, %64 : vector<8x256xf32>
    %66 = vector.shape_cast %65 : vector<8x256xf32> to vector<1x8x256xf32>
    %cst_45 = arith.constant dense<0.000000e+00> : vector<1x256xf32>
    %67 = vector.multi_reduction <add>, %66, %cst_45 [1] : vector<1x8x256xf32> to vector<1x256xf32>
    %c0_46 = arith.constant 0 : index
    %c0_47 = arith.constant 0 : index
    %68 = vector.load %arg6[%c0_46, %c0_47] : memref<256x2xf32, #tpu.memory_space<vmem>>, vector<256x2xf32>
    %cst_48 = arith.constant dense<0.000000e+00> : vector<1x2xf32>
    %69 = tpu.matmul %67, %68, %cst_48 {dimension_numbers = #tpu.dot_dimension_numbers<[1], [0], [0], [1], [0, 0, 1, 1], [], []>} : vector<1x256xf32>, vector<256x2xf32>, vector<1x2xf32> -> vector<1x2xf32>
    %cst_49 = arith.constant 5.000000e-01 : f32
    %70 = vector.broadcast %cst_49 : f32 to vector<1x2xf32>
    %71 = arith.mulf %70, %69 : vector<1x2xf32>
    %cst_50 = arith.constant 0.707106769 : f32
    %72 = vector.broadcast %cst_50 : f32 to vector<1x2xf32>
    %73 = arith.mulf %69, %72 : vector<1x2xf32>
    %74 = math.erf %73 : vector<1x2xf32>
    %cst_51 = arith.constant 1.000000e+00 : f32
    %75 = vector.broadcast %cst_51 : f32 to vector<1x2xf32>
    %76 = arith.addf %75, %74 : vector<1x2xf32>
    %77 = arith.mulf %71, %76 : vector<1x2xf32>
    %c0_52 = arith.constant 0 : index
    %c0_53 = arith.constant 0 : index
    %78 = vector.load %arg7[%c0_52, %c0_53] : memref<2x256xf32, #tpu.memory_space<vmem>>, vector<2x256xf32>
    %cst_54 = arith.constant dense<0.000000e+00> : vector<1x256xf32>
    %79 = tpu.matmul %77, %78, %cst_54 {dimension_numbers = #tpu.dot_dimension_numbers<[1], [0], [0], [1], [0, 0, 1, 1], [], []>} : vector<1x2xf32>, vector<2x256xf32>, vector<1x256xf32> -> vector<1x256xf32>
    %80 = arith.negf %79 : vector<1x256xf32>
    %81 = math.exp %80 : vector<1x256xf32>
    %cst_55 = arith.constant 1.000000e+00 : f32
    %82 = vector.broadcast %cst_55 : f32 to vector<1x256xf32>
    %83 = arith.addf %82, %81 : vector<1x256xf32>
    %84 = arith.divf %82, %83 : vector<1x256xf32>
    %85 = vector.shape_cast %84 : vector<1x256xf32> to vector<1x1x256xf32>
    %86 = vector.broadcast %85 : vector<1x1x256xf32> to vector<1x8x256xf32>
    %87 = arith.mulf %66, %86 : vector<1x8x256xf32>
    %c0_56 = arith.constant 0 : index
    %c0_57 = arith.constant 0 : index
    %88 = vector.load %arg8[%c0_56, %c0_57] : memref<128x256xbf16, #tpu.memory_space<vmem>>, vector<128x256xbf16>
    %cst_58 = arith.constant dense<0.000000e+00> : vector<8x256xf32>
    %89 = tpu.matmul %6, %88, %cst_58 {dimension_numbers = #tpu.dot_dimension_numbers<[1], [0], [0], [1], [0, 0, 1, 1], [], []>} : vector<8x128xbf16>, vector<128x256xbf16>, vector<8x256xf32> -> vector<8x256xf32>
    %c0_59 = arith.constant 0 : index
    %c0_60 = arith.constant 0 : index
    %90 = vector.load %arg9[%c0_59, %c0_60] : memref<1x256xf32, #tpu.memory_space<vmem>>, vector<1x256xf32>
    %91 = vector.broadcast %90 : vector<1x256xf32> to vector<8x256xf32>
    %92 = arith.addf %89, %91 : vector<8x256xf32>
    %93 = vector.shape_cast %92 : vector<8x256xf32> to vector<1x8x256xf32>
    %94 = arith.addf %87, %93 : vector<1x8x256xf32>
    %cst_61 = arith.constant 5.000000e-01 : f32
    %95 = vector.broadcast %cst_61 : f32 to vector<1x8x256xf32>
    %96 = arith.mulf %95, %94 : vector<1x8x256xf32>
    %cst_62 = arith.constant 0.707106769 : f32
    %97 = vector.broadcast %cst_62 : f32 to vector<1x8x256xf32>
    %98 = arith.mulf %94, %97 : vector<1x8x256xf32>
    %99 = math.erf %98 : vector<1x8x256xf32>
    %cst_63 = arith.constant 1.000000e+00 : f32
    %100 = vector.broadcast %cst_63 : f32 to vector<1x8x256xf32>
    %101 = arith.addf %100, %99 : vector<1x8x256xf32>
    %102 = arith.mulf %96, %101 : vector<1x8x256xf32>
    %c0_64 = arith.constant 0 : index
    %c0_65 = arith.constant 0 : index
    %c0_66 = arith.constant 0 : index
    %103 = vector.load %arg10[%c0_64, %c0_65, %c0_66] : memref<1x8x256xf32, #tpu.memory_space<vmem>>, vector<1x8x256xf32>
    tpu.vector_store %arg10[%c0_64, %c0_65, %c0_66], %102 {strides = array<i32>} : memref<1x8x256xf32, #tpu.memory_space<vmem>>, vector<1x8x256xf32>,
    return
  }
  func.func @transform_0(%arg0: i32) -> (i32, i32, i32) {
    %c0_i32 = arith.constant 0 : i32
    %c0_i32_0 = arith.constant 0 : i32
    %c0_i32_1 = arith.constant 0 : i32
    return %arg0, %c0_i32, %c0_i32_0 : i32, i32, i32
  }
  func.func @transform_1(%arg0: i32) -> (i32, i32, i32) {
    %c0_i32 = arith.constant 0 : i32
    %c0_i32_0 = arith.constant 0 : i32
    %c0_i32_1 = arith.constant 0 : i32
    %c0_i32_2 = arith.constant 0 : i32
    return %c0_i32, %c0_i32_0, %c0_i32_1 : i32, i32, i32
  }
  func.func @transform_2(%arg0: i32) -> (i32, i32) {
    %c0_i32 = arith.constant 0 : i32
    %c0_i32_0 = arith.constant 0 : i32
    %c0_i32_1 = arith.constant 0 : i32
    return %c0_i32, %c0_i32_0 : i32, i32
  }
  func.func @transform_3(%arg0: i32) -> (i32, i32, i32) {
    %c0_i32 = arith.constant 0 : i32
    %c0_i32_0 = arith.constant 0 : i32
    %c0_i32_1 = arith.constant 0 : i32
    %c0_i32_2 = arith.constant 0 : i32
    return %c0_i32, %c0_i32_0, %c0_i32_1 : i32, i32, i32
  }
  func.func @transform_4(%arg0: i32) -> (i32, i32) {
    %c0_i32 = arith.constant 0 : i32
    %c0_i32_0 = arith.constant 0 : i32
    %c0_i32_1 = arith.constant 0 : i32
    return %c0_i32, %c0_i32_0 : i32, i32
  }
  func.func @transform_5(%arg0: i32) -> (i32, i32) {
    %c0_i32 = arith.constant 0 : i32
    %c0_i32_0 = arith.constant 0 : i32
    %c0_i32_1 = arith.constant 0 : i32
    return %c0_i32, %c0_i32_0 : i32, i32
  }
  func.func @transform_6(%arg0: i32) -> (i32, i32) {
    %c0_i32 = arith.constant 0 : i32
    %c0_i32_0 = arith.constant 0 : i32
    %c0_i32_1 = arith.constant 0 : i32
    return %c0_i32, %c0_i32_0 : i32, i32
  }
  func.func @transform_7(%arg0: i32) -> (i32, i32) {
    %c0_i32 = arith.constant 0 : i32
    %c0_i32_0 = arith.constant 0 : i32
    %c0_i32_1 = arith.constant 0 : i32
    return %c0_i32, %c0_i32_0 : i32, i32
  }
  func.func @transform_8(%arg0: i32) -> (i32, i32) {
    %c0_i32 = arith.constant 0 : i32
    %c0_i32_0 = arith.constant 0 : i32
    %c0_i32_1 = arith.constant 0 : i32
    return %c0_i32, %c0_i32_0 : i32, i32
  }
  func.func @transform_9(%arg0: i32) -> (i32, i32, i32) {
    %c0_i32 = arith.constant 0 : i32
    %c0_i32_0 = arith.constant 0 : i32
    %c0_i32_1 = arith.constant 0 : i32
    return %arg0, %c0_i32, %c0_i32_0 : i32, i32, i32
  }
}

</mosaic_0001>

<bundles_post_ra>
// kernel: tile.35
= control target key start
LH: loop header
LB: loop body
LE: loop exit
PB: predicated region body
PF: predicated region fallthrough
CT: control target
= control target key end

     0   :  { %s49_s8 = smov 96   ;;  %vm3_vm0 = vcmask 261120   ;;  %s51_s15 = smov 64   ;;  %vm11_vm1 = vcmask 1048320   ;;  %vm19_vm2 = vcmask 785920   ;;  %vm27_vm3 = vcmask 523520   ;;  %s80_s0 = inlined_call_operand.vmem [shape: f32[2,8,32], index: 0, kind: input, shape index: {}]   ;;  %s81_s1 = inlined_call_operand.vmem [shape: f32[2,256], index: 1, kind: output, shape index: {}]  }
   0x1   :  { %v42_v0 = vld.sshfl [vmem:[%s80_s0 + $0x3] sm:$0xff pattern:$0xccccc480]   ;;  %v43_v1 = vld.sshfl [vmem:[%s80_s0 + $0x2] sm:$0xff pattern:$0xccccc480]  }
   0x2   :  { %9 = vrot.lane.b32.xlu0 %v42_v0, %s49_s8  ;;  %v44_v2 = vld.sshfl [vmem:[%s80_s0 + $0x1] sm:$0xff pattern:$0xccccc480]   ;;  %v2_v3 = vld [vmem:[%s80_s0] ss:$4 sm:$0xf]  }
   0x3   :  { %s50_s0 = smov 32   ;;  %4 = vst.msk [vmem:[#allocation0] ss:$8 sm:$0x3] %vm3_vm0, %v2_v3  }
   0x4   :  { %25 = vrot.lane.b32.xlu1 %v44_v2, %s50_s0  ;;  %6 = vst.msk [vmem:[#allocation0 - $0xf] ss:$8 sm:$0xc] %vm3_vm0, %v2_v3  }
   0x6   :  { %17 = vrot.lane.b32.xlu0 %v43_v1, %s51_s15 }
  0x74   :  { %v10_v4 = vpop.permute.xlu0 %9  }
  0x75   :  { %12 = vst.msk [vmem:[#allocation0] sm:$0x3] %vm11_vm1, %v10_v4   ;;  %14 = vst.msk [vmem:[#allocation0 + $0x6] sm:$0xc] %vm11_vm1, %v10_v4  }
  0x76   :  { %v26_v5 = vpop.permute.xlu1 %25  }
  0x78   :  { %v18_v6 = vpop.permute.xlu0 %17  }
  0x79   :  { %20 = vst.msk [vmem:[#allocation0] sm:$0x3] %vm19_vm2, %v18_v6   ;;  %22 = vst.msk [vmem:[#allocation0 + $0x6] sm:$0xc] %vm19_vm2, %v18_v6  }
  0x7a   :  { %28 = vst.msk [vmem:[#allocation0] sm:$0x3] %vm27_vm3, %v26_v5   ;;  %30 = vst.msk [vmem:[#allocation0 + $0x6] sm:$0xc] %vm27_vm3, %v26_v5  }
  0x81   :  { %v34_v7 = vld [vmem:[#allocation0] sm:$0x3]  ;;  %v38_v8 = vld [vmem:[#allocation0 + $0x8] sm:$0x3] }
  0x82   :  { %36 = vst [vmem:[%s81_s1] sm:$0x3] %v34_v7  ;;  %45 = vst [vmem:[%s81_s1 + $0x2] sm:$0x3] %v38_v8 }

// kernel: down_forward.1
= control target key start
LH: loop header
LB: loop body
LE: loop exit
PB: predicated region body
PF: predicated region fallthrough
CT: control target
= control target key end

     0   :  { %s2673_s30 = smov 0   ;;  %s3327_s0 = inlined_call_operand.vmem [shape: f32[2,10,128], index: 0, kind: input, shape index: {}]   ;;  %s3328_s1 = inlined_call_operand.vmem [shape: bf16[3,128,256], index: 1, kind: input, shape index: {}]   ;;  %s3329_s2 = inlined_call_operand.vmem [shape: f32[1,256], index: 2, kind: input, shape index: {}]   ;;  %s3330_s3 = inlined_call_operand.vmem [shape: bf16[3,256,256], index: 3, kind: input, shape index: {}]   ;;  %s3331_s4 = inlined_call_operand.vmem [shape: f32[1,256], index: 4, kind: input, shape index: {}]   ;;  %s3332_s5 = inlined_call_operand.vmem [shape: f32[256,2], index: 5, kind: input, shape index: {}]   ;;  %s3333_s6 = inlined_call_operand.vmem [shape: f32[2,256], index: 6, kind: input, shape index: {}]   ;;  %s3334_s7 = inlined_call_operand.vmem [shape: bf16[128,256], index: 7, kind: input, shape index: {}]   ;;  %s3335_s8 = inlined_call_operand.vmem [shape: f32[1,256], index: 8, kind: input, shape index: {}]   ;;  %s3336_s9 = inlined_call_operand.vmem [shape: f32[2,8,256], index: 9, kind: output, shape index: {}]  }
   0x1 LB: > { %s2003_s10 = sadd.s32 4294967295, %s2619_s30   ;;  %p2007_p0 = scmp.ge.s32.totalorder %s2619_s30, 1  ;;  %s2619_s30 = sphi %s2673_s30, %s19_s30  }
   0x2   : > { %p287_p1 = scmp.lt.s32.totalorder %s2619_s30, 3 }
   0x4   : > { %p288_p2 = pnand %p2007_p0, %p287_p1 }
   0x5   : > { %v2355_v0 = vld [vmem:[%s3328_s1 + $0x84] ss:$8 sps:$4 sm:$0xff] (!%p288_p2)   ;;  %v2621_v2 = vmov (!%p288_p2), 0   ;;  %v2359_v3 = vld [vmem:[%s3328_s1 + $0x80] ss:$8 sps:$4 sm:$0xff] (!%p288_p2)   ;;  %p323_p3 = scmp.lt.s32.totalorder (!%p288_p2), %s2003_s10, 1 }
   0x6   : > { %291 = sbr.rel (%p288_p2) target bundleno = 1113 (0x459), region = 56  ;;  %v2357_v1 = vld [vmem:[%s3328_s1 + $0x4] ss:$8 sps:$4 sm:$0xff] (!%p288_p2)   ;;  %491 = vmatprep.mubr.bf16.mxu0 (!%p288_p2), %v2621_v2  ;;  %612 = vmatprep.mubr.bf16.mxu1 (!%p288_p2), %v2621_v2  ;;  %v2360_v4 = vld [vmem:[%s3328_s1] ss:$8 sps:$4 sm:$0xff] (!%p288_p2)   ;;  %vm1687_vm1 = vcmask (!%p288_p2), 1041408  }
   0x7   : > { %459 = vmatprep.subr.bf16.mxu0 (!%p288_p2), %v2355_v0  ;;  %580 = vmatprep.subr.bf16.mxu1 (!%p288_p2), %v2357_v1  ;;  %v2361_v5 = vld [vmem:[%s3328_s1 + $0x94] ss:$8 sps:$4 sm:$0xff] (!%p288_p2)   ;;  %v2365_v7 = vld [vmem:[%s3328_s1 + $0x90] ss:$8 sps:$4 sm:$0xff] (!%p288_p2)   ;;  %v2367_v9 = vld [vmem:[%s3328_s1 + $0xa4] ss:$8 sps:$4 sm:$0xff] (!%p288_p2)  }
   0x8   : > { %460 = vmatpush1.bf16.msra.mxu0 (!%p288_p2), %v2359_v3  ;;  %581 = vmatpush1.bf16.msra.mxu1 (!%p288_p2), %v2360_v4  ;;  %v2363_v6 = vld [vmem:[%s3328_s1 + $0x14] ss:$8 sps:$4 sm:$0xff] (!%p288_p2)   ;;  %v2366_v8 = vld [vmem:[%s3328_s1 + $0x10] ss:$8 sps:$4 sm:$0xff] (!%p288_p2)   ;;  %v2369_v10 = vld [vmem:[%s3328_s1 + $0x24] ss:$8 sps:$4 sm:$0xff] (!%p288_p2)  }
   0x9   : > { %461 = vmatprep.subr.bf16.mxu0 (!%p288_p2), %v2361_v5  ;;  %582 = vmatprep.subr.bf16.mxu1 (!%p288_p2), %v2363_v6  ;;  %v2371_v11 = vld [vmem:[%s3328_s1 + $0xa0] ss:$8 sps:$4 sm:$0xff] (!%p288_p2)   ;;  %v2373_v13 = vld [vmem:[%s3328_s1 + $0xb4] ss:$8 sps:$4 sm:$0xff] (!%p288_p2)   ;;  %v2377_v15 = vld [vmem:[%s3328_s1 + $0xb0] ss:$8 sps:$4 sm:$0xff] (!%p288_p2)  }
   0xa   : > { %v2372_v12 = vld [vmem:[%s3328_s1 + $0x20] ss:$8 sps:$4 sm:$0xff] (!%p288_p2)   ;;  %v2375_v14 = vld [vmem:[%s3328_s1 + $0x34] ss:$8 sps:$4 sm:$0xff] (!%p288_p2)   ;;  %v2378_v16 = vld [vmem:[%s3328_s1 + $0x30] ss:$8 sps:$4 sm:$0xff] (!%p288_p2)  }
   0xb   : > { %v2379_v17 = vld [vmem:[%s3328_s1 + $0xc4] ss:$8 sps:$4 sm:$0xff] (!%p288_p2)   ;;  %v2383_v19 = vld [vmem:[%s3328_s1 + $0xc0] ss:$8 sps:$4 sm:$0xff] (!%p288_p2)   ;;  %v2385_v21 = vld [vmem:[%s3328_s1 + $0xd4] ss:$8 sps:$4 sm:$0xff] (!%p288_p2)  }
   0xc   : > { %462 = vmatpush1.bf16.msra.mxu0 (!%p288_p2), %v2365_v7  ;;  %583 = vmatpush1.bf16.msra.mxu1 (!%p288_p2), %v2366_v8  ;;  %v2381_v18 = vld [vmem:[%s3328_s1 + $0x44] ss:$8 sps:$4 sm:$0xff] (!%p288_p2)   ;;  %v2384_v20 = vld [vmem:[%s3328_s1 + $0x40] ss:$8 sps:$4 sm:$0xff] (!%p288_p2)   ;;  %v2387_v22 = vld [vmem:[%s3328_s1 + $0x54] ss:$8 sps:$4 sm:$0xff] (!%p288_p2)  }
   0xd   : > { %463 = vmatprep.subr.bf16.mxu0 %v2367_v9  ;;  %584 = vmatprep.subr.bf16.mxu1 %v2369_v10  ;;  %s3338_s10 = smov (!%p323_p3, %s2003_s10), 1  ;;  %v2389_v23 = vld [vmem:[%s3328_s1 + $0xd0] ss:$8 sps:$4 sm:$0xff]   ;;  %v2391_v25 = vld [vmem:[%s3328_s1 + $0xe4] ss:$8 sps:$4 sm:$0xff]   ;;  %vm1683_vm2 = vcmask 15360  }
   0xe   : > { %s2276_s13 = sshll.u32 %s3338_s10, 4  ;;  %v2390_v24 = vld [vmem:[%s3328_s1 + $0x50] ss:$8 sps:$4 sm:$0xff]   ;;  %v2393_v26 = vld [vmem:[%s3328_s1 + $0x64] ss:$8 sps:$4 sm:$0xff]  }
   0xf   : > { %s327_s20 = scalar_lea.vmem %s3327_s0, %s2276_s13  ;;  %v2395_v30 = vld [vmem:[%s3328_s1 + $0xe0] ss:$8 sps:$4 sm:$0xff]   ;;  %v2397_v32 = vld [vmem:[%s3328_s1 + $0xf4] ss:$8 sps:$4 sm:$0xff]   ;;  %v2401_v37 = vld [vmem:[%s3328_s1 + $0xf0] ss:$8 sps:$4 sm:$0xff]   ;;  %s332_s29 = scalar_lea.vmem %s3336_s9, %s2276_s13 }
  0x10   : > { %464 = vmatpush1.bf16.msra.mxu0 %v2371_v11  ;;  %585 = vmatpush1.bf16.msra.mxu1 %v2372_v12  ;;  %v334_v27 = vld [vmem:[%s327_s20] sm:$0xff]  ;;  %v335_v28 = vld [vmem:[%s327_s20 + $0x8] sm:$0x3]  ;;  %v2399_v34 = vld [vmem:[%s3328_s1 + $0x74] ss:$8 sps:$4 sm:$0xff]  }
  0x11   : > { %465 = vmatprep.subr.bf16.mxu0 %v2373_v13  ;;  %586 = vmatprep.subr.bf16.mxu1 %v2375_v14  ;;  %v337_v29 = vpack.c.bf16 %v335_v28, %v334_v27  ;;  %v2396_v31 = vld [vmem:[%s3328_s1 + $0x60] ss:$8 sps:$4 sm:$0xff]   ;;  %v2402_v38 = vld [vmem:[%s3328_s1 + $0x70] ss:$8 sps:$4 sm:$0xff]   ;;  %v2405_v39 = vld [vmem:[%s3328_s1 + $0x104] ss:$8 sps:$4 sm:$0xff]   ;;  %v336_v41 = vpack.c.bf16 %v334_v27, %v334_v27 }
  0x12   : > { %v2403_v42 = vld [vmem:[%s3328_s1 + $0x100] ss:$8 sps:$4 sm:$0xff]   ;;  %v2408_v43 = vld [vmem:[%s3328_s1 + $0x114] ss:$8 sps:$4 sm:$0xff]   ;;  %v2406_v44 = vld [vmem:[%s3328_s1 + $0x110] ss:$8 sps:$4 sm:$0xff]  }
  0x13   : > { %v374_v33 = vshll.u32 %v337_v29, 16  ;;  %v372_v35 = vshrl.u32 %v337_v29, 16  ;;  %v2411_v45 = vld [vmem:[%s3328_s1 + $0x124] ss:$8 sps:$4 sm:$0xff]   ;;  %v2409_v46 = vld [vmem:[%s3328_s1 + $0x120] ss:$8 sps:$4 sm:$0xff]  }
  0x14   : > { %466 = vmatpush1.bf16.msra.mxu0 %v2377_v15  ;;  %587 = vmatpush1.bf16.msra.mxu1 %v2378_v16  ;;  %v2414_v47 = vld [vmem:[%s3328_s1 + $0x134] ss:$8 sps:$4 sm:$0xff]   ;;  %v2412_v48 = vld [vmem:[%s3328_s1 + $0x130] ss:$8 sps:$4 sm:$0xff]   ;;  %v2417_v49 = vld [vmem:[%s3328_s1 + $0x144] ss:$8 sps:$4 sm:$0xff]  }
  0x15   : > { %467 = vmatprep.subr.bf16.mxu0 %v2379_v17  ;;  %588 = vmatprep.subr.bf16.mxu1 %v2381_v18  ;;  %v376_v36 = vrot.slane %v374_v33, 1  ;;  %v2415_v50 = vld [vmem:[%s3328_s1 + $0x140] ss:$8 sps:$4 sm:$0xff]   ;;  %v2420_v51 = vld [vmem:[%s3328_s1 + $0x154] ss:$8 sps:$4 sm:$0xff]   ;;  %v639_v57 = vrot.slane %v337_v29, 1 }
  0x16   : > { %v2418_v52 = vld [vmem:[%s3328_s1 + $0x150] ss:$8 sps:$4 sm:$0xff]   ;;  %v2423_v53 = vld [vmem:[%s3328_s1 + $0x164] ss:$8 sps:$4 sm:$0xff]   ;;  %v2421_v54 = vld [vmem:[%s3328_s1 + $0x160] ss:$8 sps:$4 sm:$0xff]  }
  0x17   : > { %v2794_v40 = vor.u32 %v376_v36, %v372_v35  ;;  %v2426_v55 = vld [vmem:[%s3328_s1 + $0x174] ss:$8 sps:$4 sm:$0xff]   ;;  %v2424_v56 = vld [vmem:[%s3328_s1 + $0x170] ss:$8 sps:$4 sm:$0xff]   ;;  %v2429_v58 = vld [vmem:[%s3330_s3 + $0x4] ss:$8 sps:$4 sm:$0xff]  }
  0x18   : > { %468 = vmatpush1.bf16.msra.mxu0 %v2383_v19  ;;  %589 = vmatpush1.bf16.msra.mxu1 %v2384_v20  ;;  %v2427_v59 = vld [vmem:[%s3330_s3] ss:$8 sps:$4 sm:$0xff]   ;;  %v2432_v60 = vld [vmem:[%s3330_s3 + $0x14] ss:$8 sps:$4 sm:$0xff]   ;;  %v2435_v62 = vld [vmem:[%s3330_s3 + $0x104] ss:$8 sps:$4 sm:$0xff]  }
  0x19   : > { %469 = vmatprep.subr.bf16.mxu0 %v2385_v21  ;;  %590 = vmatprep.subr.bf16.mxu1 %v2387_v22  ;;  %v2433_v61 = vld [vmem:[%s3330_s3 + $0x100] ss:$8 sps:$4 sm:$0xff]   ;;  %v2430_v63 = vld [vmem:[%s3330_s3 + $0x10] ss:$8 sps:$4 sm:$0xff]   ;;  %v2441_v0 = vld [vmem:[%s3330_s3 + $0x114] ss:$8 sps:$4 sm:$0xff]  }
  0x1a   : > { %v2438_v1 = vld [vmem:[%s3330_s3 + $0x24] ss:$8 sps:$4 sm:$0xff]   ;;  %v2439_v3 = vld [vmem:[%s3330_s3 + $0x110] ss:$8 sps:$4 sm:$0xff]   ;;  %v2436_v5 = vld [vmem:[%s3330_s3 + $0x20] ss:$8 sps:$4 sm:$0xff]  }
  0x1b   : > { %v2447_v4 = vld [vmem:[%s3330_s3 + $0x124] ss:$8 sps:$4 sm:$0xff]   ;;  %v2444_v6 = vld [vmem:[%s3330_s3 + $0x34] ss:$8 sps:$4 sm:$0xff]   ;;  %v2445_v7 = vld [vmem:[%s3330_s3 + $0x120] ss:$8 sps:$4 sm:$0xff]  }
  0x1c   : > { %470 = vmatpush1.bf16.msra.mxu0 %v2389_v23  ;;  %591 = vmatpush1.bf16.msra.mxu1 %v2390_v24  ;;  %v2453_v8 = vld [vmem:[%s3330_s3 + $0x134] ss:$8 sps:$4 sm:$0xff]   ;;  %v2442_v9 = vld [vmem:[%s3330_s3 + $0x30] ss:$8 sps:$4 sm:$0xff]   ;;  %v2450_v10 = vld [vmem:[%s3330_s3 + $0x44] ss:$8 sps:$4 sm:$0xff]  }
  0x1d   : > { %471 = vmatprep.subr.bf16.mxu0 %v2391_v25  ;;  %592 = vmatprep.subr.bf16.mxu1 %v2393_v26  ;;  %v2451_v11 = vld [vmem:[%s3330_s3 + $0x130] ss:$8 sps:$4 sm:$0xff]   ;;  %v2459_v12 = vld [vmem:[%s3330_s3 + $0x144] ss:$8 sps:$4 sm:$0xff]   ;;  %v2448_v13 = vld [vmem:[%s3330_s3 + $0x40] ss:$8 sps:$4 sm:$0xff]  }
  0x1e   : > { %v2456_v14 = vld [vmem:[%s3330_s3 + $0x54] ss:$8 sps:$4 sm:$0xff]   ;;  %v2457_v15 = vld [vmem:[%s3330_s3 + $0x140] ss:$8 sps:$4 sm:$0xff]   ;;  %v2454_v17 = vld [vmem:[%s3330_s3 + $0x50] ss:$8 sps:$4 sm:$0xff]  }
  0x1f   : > { %v2465_v16 = vld [vmem:[%s3330_s3 + $0x154] ss:$8 sps:$4 sm:$0xff]   ;;  %v2462_v18 = vld [vmem:[%s3330_s3 + $0x64] ss:$8 sps:$4 sm:$0xff]   ;;  %v2463_v19 = vld [vmem:[%s3330_s3 + $0x150] ss:$8 sps:$4 sm:$0xff]  }
  0x20   : > { %472 = vmatpush1.bf16.msra.mxu0 %v2395_v30  ;;  %593 = vmatpush1.bf16.msra.mxu1 %v2396_v31  ;;  %v2460_v20 = vld [vmem:[%s3330_s3 + $0x60] ss:$8 sps:$4 sm:$0xff]   ;;  %v2468_v21 = vld [vmem:[%s3330_s3 + $0x74] ss:$8 sps:$4 sm:$0xff]   ;;  %v2466_v22 = vld [vmem:[%s3330_s3 + $0x70] ss:$8 sps:$4 sm:$0xff]  }
  0x21   : > { %473 = vmatprep.subr.bf16.mxu0 %v2397_v32  ;;  %594 = vmatprep.subr.bf16.mxu1 %v2399_v34  ;;  %v2471_v23 = vld [vmem:[%s3330_s3 + $0x164] ss:$8 sps:$4 sm:$0xff]   ;;  %v2469_v24 = vld [vmem:[%s3330_s3 + $0x160] ss:$8 sps:$4 sm:$0xff]   ;;  %v2477_v27 = vld [vmem:[%s3330_s3 + $0x174] ss:$8 sps:$4 sm:$0xff]  }
  0x22   : > { %v2474_v25 = vld [vmem:[%s3330_s3 + $0x84] ss:$8 sps:$4 sm:$0xff]   ;;  %v2472_v26 = vld [vmem:[%s3330_s3 + $0x80] ss:$8 sps:$4 sm:$0xff]   ;;  %v2475_v28 = vld [vmem:[%s3330_s3 + $0x170] ss:$8 sps:$4 sm:$0xff]  }
  0x23   : > { %v2480_v29 = vld [vmem:[%s3330_s3 + $0x94] ss:$8 sps:$4 sm:$0xff]   ;;  %v2478_v30 = vld [vmem:[%s3330_s3 + $0x90] ss:$8 sps:$4 sm:$0xff]   ;;  %v2483_v31 = vld [vmem:[%s3330_s3 + $0x184] ss:$8 sps:$4 sm:$0xff]  }
  0x24   : > { %474 = vmatpush1.bf16.msra.mxu0 %v2401_v37  ;;  %595 = vmatpush1.bf16.msra.mxu1 %v2402_v38  ;;  %v2481_v32 = vld [vmem:[%s3330_s3 + $0x180] ss:$8 sps:$4 sm:$0xff]   ;;  %v2486_v33 = vld [vmem:[%s3330_s3 + $0xa4] ss:$8 sps:$4 sm:$0xff]   ;;  %v2489_v35 = vld [vmem:[%s3330_s3 + $0x194] ss:$8 sps:$4 sm:$0xff]  }
  0x25   : > { %721 = vmatprep.subr.bf16.mxu0 %v2405_v39  ;;  %1056 = vmatprep.subr.bf16.mxu1 %v2435_v62  ;;  %v2484_v34 = vld [vmem:[%s3330_s3 + $0xa0] ss:$8 sps:$4 sm:$0xff]   ;;  %v2487_v36 = vld [vmem:[%s3330_s3 + $0x190] ss:$8 sps:$4 sm:$0xff]   ;;  %v2492_v37 = vld [vmem:[%s3330_s3 + $0xb4] ss:$8 sps:$4 sm:$0xff]  }
  0x26   : > { %v2490_v38 = vld [vmem:[%s3330_s3 + $0xb0] ss:$8 sps:$4 sm:$0xff]   ;;  %v2495_v39 = vld [vmem:[%s3330_s3 + $0x1a4] ss:$8 sps:$4 sm:$0xff]  }
  0x27   : > { %492 = vmatmul.mubr.bf16.vlgmr.msra.gmra.mrb[0].mxu0 %v2794_v40  ;;  %613 = vmatmul.mubr.bf16.vlgmr.msra.gmra.mrb[0].mxu1 %v336_v41  ;;  %v2493_v41 = vld [vmem:[%s3330_s3 + $0x1a0] ss:$8 sps:$4 sm:$0xff]   ;;  %v2525_v62 = vld [vmem:[%s3330_s3 + $0x204] ss:$8 sps:$4 sm:$0xff]  }
  0x28   : > { %722 = vmatpush1.bf16.msra.mxu0 %v2403_v42  ;;  %753 = vmatprep.mubr.bf16.mxu0 %v2621_v2  ;;  %v766_v42 = vlaneseq }
  0x29   : > { %723 = vmatprep.subr.bf16.mxu0 %v2408_v43  ;;  %1057 = vmatpush1.bf16.msra.mxu1 %v2433_v61  ;;  %v2498_v43 = vld [vmem:[%s3330_s3 + $0xc4] ss:$8 sps:$4 sm:$0xff]   ;;  %v2520_v61 = vld [vmem:[%s3330_s3 + $0x1f0] ss:$8 sps:$4 sm:$0xff]  }
  0x2a   : > { %1058 = vmatprep.subr.bf16.mxu1 %v2441_v0  ;;  %vm790_vm0 = vcmp.lt.s32.totalorder %v766_v42, 256 }
  0x2c   : > { %724 = vmatpush1.bf16.msra.mxu0 %v2406_v44  ;;  %v2496_v44 = vld [vmem:[%s3330_s3 + $0xc0] ss:$8 sps:$4 sm:$0xff]  }
  0x2d   : > { %725 = vmatprep.subr.bf16.mxu0 %v2411_v45  ;;  %1059 = vmatpush1.bf16.msra.mxu1 %v2439_v3  ;;  %v2501_v45 = vld [vmem:[%s3330_s3 + $0x1b4] ss:$8 sps:$4 sm:$0xff]  }
  0x2e   : > { %1060 = vmatprep.subr.bf16.mxu1 %v2447_v4 }
  0x30   : > { %726 = vmatpush1.bf16.msra.mxu0 %v2409_v46  ;;  %v2499_v46 = vld [vmem:[%s3330_s3 + $0x1b0] ss:$8 sps:$4 sm:$0xff]  }
  0x31   : > { %727 = vmatprep.subr.bf16.mxu0 %v2414_v47  ;;  %1061 = vmatpush1.bf16.msra.mxu1 %v2445_v7  ;;  %v2622_v47 = vmov 0.0  }
  0x32   : > { %1062 = vmatprep.subr.bf16.mxu1 %v2453_v8  ;;  %792 = vst.msk [vmem:[#allocation2] ss:$8 sm:$0x3] %vm790_vm0, %v2622_v47  ;;  %795 = vst.msk [vmem:[#allocation2 + $0x11] ss:$8 sm:$0x3] %vm790_vm0, %v2622_v47 }
  0x34   : > { %728 = vmatpush1.bf16.msra.mxu0 %v2412_v48  ;;  %v2504_v48 = vld [vmem:[%s3330_s3 + $0xd4] ss:$8 sps:$4 sm:$0xff]  }
  0x35   : > { %729 = vmatprep.subr.bf16.mxu0 %v2417_v49  ;;  %1063 = vmatpush1.bf16.msra.mxu1 %v2451_v11  ;;  %v2502_v49 = vld [vmem:[%s3330_s3 + $0xd0] ss:$8 sps:$4 sm:$0xff]  }
  0x36   : > { %1064 = vmatprep.subr.bf16.mxu1 %v2459_v12  ;;  %v764_v12 = vld [vmem:[%s3329_s2] sm:$0x3] }
  0x38   : > { %730 = vmatpush1.bf16.msra.mxu0 %v2415_v50  ;;  %v2507_v50 = vld [vmem:[%s3330_s3 + $0x1c4] ss:$8 sps:$4 sm:$0xff]  }
  0x39   : > { %731 = vmatprep.subr.bf16.mxu0 %v2420_v51  ;;  %1065 = vmatpush1.bf16.msra.mxu1 %v2457_v15  ;;  %v2505_v51 = vld [vmem:[%s3330_s3 + $0x1c0] ss:$8 sps:$4 sm:$0xff]  }
  0x3a   : > { %1066 = vmatprep.subr.bf16.mxu1 %v2465_v16 }
  0x3c   : > { %732 = vmatpush1.bf16.msra.mxu0 %v2418_v52  ;;  %v2508_v52 = vld [vmem:[%s3330_s3 + $0xe0] ss:$8 sps:$4 sm:$0xff]  }
  0x3d   : > { %733 = vmatprep.subr.bf16.mxu0 %v2423_v53  ;;  %1067 = vmatpush1.bf16.msra.mxu1 %v2463_v19  ;;  %v2510_v53 = vld [vmem:[%s3330_s3 + $0xe4] ss:$8 sps:$4 sm:$0xff]  }
  0x3e   : > { %1068 = vmatprep.subr.bf16.mxu1 %v2471_v23 }
  0x40   : > { %734 = vmatpush1.bf16.msra.mxu0 %v2421_v54  ;;  %v2511_v54 = vld [vmem:[%s3330_s3 + $0x1d0] ss:$8 sps:$4 sm:$0xff]  }
  0x41   : > { %735 = vmatprep.subr.bf16.mxu0 %v2426_v55  ;;  %1069 = vmatpush1.bf16.msra.mxu1 %v2469_v24  ;;  %v2513_v55 = vld [vmem:[%s3330_s3 + $0x1d4] ss:$8 sps:$4 sm:$0xff]  }
  0x42   : > { %1070 = vmatprep.subr.bf16.mxu1 %v2477_v27 }
  0x44   : > { %736 = vmatpush1.bf16.msra.mxu0 %v2424_v56  ;;  %v2516_v56 = vld [vmem:[%s3330_s3 + $0xf4] ss:$8 sps:$4 sm:$0xff]  }
  0x45   : > { %1257 = vmatprep.subr.bf16.mxu0 %v2429_v58  ;;  %1071 = vmatpush1.bf16.msra.mxu1 %v2475_v28  ;;  %v2514_v58 = vld [vmem:[%s3330_s3 + $0xf0] ss:$8 sps:$4 sm:$0xff]  }
  0x46   : > { %1072 = vmatprep.subr.bf16.mxu1 %v2483_v31 }
  0x47   : > { %754 = vmatmul.mubr.bf16.vlgmr.msra.gmra.mrb[4].mxu0 %v639_v57  ;;  %v2519_v57 = vld [vmem:[%s3330_s3 + $0x1e4] ss:$8 sps:$4 sm:$0xff]  }
  0x48   : > { %1258 = vmatpush1.bf16.msra.mxu0 %v2427_v59  ;;  %v2517_v59 = vld [vmem:[%s3330_s3 + $0x1e0] ss:$8 sps:$4 sm:$0xff]  }
  0x49   : > { %1259 = vmatprep.subr.bf16.mxu0 %v2432_v60  ;;  %1073 = vmatpush1.bf16.msra.mxu1 %v2481_v32  ;;  %v2522_v60 = vld [vmem:[%s3330_s3 + $0x1f4] ss:$8 sps:$4 sm:$0xff]  }
  0x4a   : > { %1074 = vmatprep.subr.bf16.mxu1 %v2489_v35 }
  0x4c   : > { %1260 = vmatpush1.bf16.msra.mxu0 %v2430_v63 }
  0x4d   : > { %1261 = vmatprep.subr.bf16.mxu0 %v2438_v1  ;;  %1075 = vmatpush1.bf16.msra.mxu1 %v2487_v36 }
  0x4e   : > { %1076 = vmatprep.subr.bf16.mxu1 %v2495_v39 }
  0x50   : > { %1262 = vmatpush1.bf16.msra.mxu0 %v2436_v5 }
  0x51   : > { %1263 = vmatprep.subr.bf16.mxu0 %v2444_v6  ;;  %1077 = vmatpush1.bf16.msra.mxu1 %v2493_v41 }
  0x52   : > { %1078 = vmatprep.subr.bf16.mxu1 %v2501_v45 }
  0x54   : > { %1264 = vmatpush1.bf16.msra.mxu0 %v2442_v9 }
  0x55   : > { %1265 = vmatprep.subr.bf16.mxu0 %v2450_v10  ;;  %1079 = vmatpush1.bf16.msra.mxu1 %v2499_v46  ;;  %v767_v10 = vshrl.u32 %v766_v42, 7 }
  0x56   : > { %1080 = vmatprep.subr.bf16.mxu1 %v2507_v50 }
  0x57   : > { %v3040_v11 = vsub.s32 0, %v767_v10 }
  0x58   : > { %1266 = vmatpush1.bf16.msra.mxu0 %v2448_v13  ;;  %v3045_v13 = vsub.s32 1, %v767_v10  ;;  %v2550_v10 = vld [vmem:[%s3330_s3 + $0x290] ss:$8 sps:$4 sm:$0xff]  }
  0x59   : > { %1267 = vmatprep.subr.bf16.mxu0 %v2456_v14  ;;  %1081 = vmatpush1.bf16.msra.mxu1 %v2505_v51  ;;  %v769_v14 = vrot.slane %v764_v12, %v3040_v11 }
  0x5a   : > { %1082 = vmatprep.subr.bf16.mxu1 %v2513_v55  ;;  %v773_v16 = vrot.slane %v764_v12, %v3045_v13  ;;  %v2528_v55 = vld [vmem:[%s3330_s3 + $0x214] ss:$8 sps:$4 sm:$0xff]   ;;  %v2555_v12 = vld [vmem:[%s3330_s3 + $0x2a4] ss:$8 sps:$4 sm:$0xff]  }
  0x5c   : > { %1268 = vmatpush1.bf16.msra.mxu0 %v2454_v17 }
  0x5d   : > { %1269 = vmatprep.subr.bf16.mxu0 %v2462_v18  ;;  %1083 = vmatpush1.bf16.msra.mxu1 %v2511_v54 }
  0x5e   : > { %1084 = vmatprep.subr.bf16.mxu1 %v2519_v57  ;;  %v2526_v57 = vld [vmem:[%s3330_s3 + $0x210] ss:$8 sps:$4 sm:$0xff]  }
  0x60   : > { %1270 = vmatpush1.bf16.msra.mxu0 %v2460_v20 }
  0x61   : > { %1271 = vmatprep.subr.bf16.mxu0 %v2468_v21  ;;  %1085 = vmatpush1.bf16.msra.mxu1 %v2517_v59  ;;  %v2529_v59 = vld [vmem:[%s3330_s3 + $0x220] ss:$8 sps:$4 sm:$0xff]  }
  0x62   : > { %1086 = vmatprep.subr.bf16.mxu1 %v2522_v60  ;;  %v2534_v60 = vld [vmem:[%s3330_s3 + $0x234] ss:$8 sps:$4 sm:$0xff]  }
  0x64   : > { %1272 = vmatpush1.bf16.msra.mxu0 %v2466_v22 }
  0x65   : > { %1273 = vmatprep.subr.bf16.mxu0 %v2474_v25  ;;  %1087 = vmatpush1.bf16.msra.mxu1 %v2520_v61  ;;  %v2532_v61 = vld [vmem:[%s3330_s3 + $0x230] ss:$8 sps:$4 sm:$0xff]  }
  0x66   : > { %1497 = vmatprep.subr.bf16.mxu1 %v2525_v62  ;;  %v2537_v62 = vld [vmem:[%s3330_s3 + $0x244] ss:$8 sps:$4 sm:$0xff]  }
  0x68   : > { %1274 = vmatpush1.bf16.msra.mxu0 %v2472_v26 }
  0x69   : > { %1275 = vmatprep.subr.bf16.mxu0 %v2480_v29 }
  0x6c   : > { %1276 = vmatpush1.bf16.msra.mxu0 %v2478_v30 }
  0x6d   : > { %1277 = vmatprep.subr.bf16.mxu0 %v2486_v33 }
  0x70   : > { %1278 = vmatpush1.bf16.msra.mxu0 %v2484_v34 }
  0x71   : > { %1279 = vmatprep.subr.bf16.mxu0 %v2492_v37 }
  0x74   : > { %1280 = vmatpush1.bf16.msra.mxu0 %v2490_v38 }
  0x75   : > { %1281 = vmatprep.subr.bf16.mxu0 %v2498_v43 }
  0x78   : > { %1282 = vmatpush1.bf16.msra.mxu0 %v2496_v44 }
  0x79   : > { %1283 = vmatprep.subr.bf16.mxu0 %v2504_v48 }
  0x7c   : > { %1284 = vmatpush1.bf16.msra.mxu0 %v2502_v49 }
  0x7d   : > { %1285 = vmatprep.subr.bf16.mxu0 %v2510_v53  ;;  %v2523_v53 = vld [vmem:[%s3330_s3 + $0x200] ss:$8 sps:$4 sm:$0xff]  }
  0x80   : > { %1286 = vmatpush1.bf16.msra.mxu0 %v2508_v52 }
  0x81   : > { %1287 = vmatprep.subr.bf16.mxu0 %v2516_v56 }
  0x84   : > { %1288 = vmatpush1.bf16.msra.mxu0 %v2514_v58  ;;  %v2531_v58 = vld [vmem:[%s3330_s3 + $0x224] ss:$8 sps:$4 sm:$0xff]  }
  0xfa   : > { %v493_v63 = vpop.f32.mrb[0].mxu0  ;;  %v614_v0 = vpop.f32.mrb[0].mxu1 }
  0xfb   : > { %v615_v1 = vadd.f32 %v614_v0, %v493_v63  ;;  %v495_v3 = vpop.f32.mrb[1].mxu0  ;;  %v616_v4 = vpop.f32.mrb[1].mxu1  ;;  %v2535_v63 = vld [vmem:[%s3330_s3 + $0x240] ss:$8 sps:$4 sm:$0xff]   ;;  %v2540_v0 = vld [vmem:[%s3330_s3 + $0x254] ss:$8 sps:$4 sm:$0xff]  }
  0xfc   : > { %v617_v5 = vadd.f32 %v616_v4, %v495_v3  ;;  %v497_v6 = vpop.f32.mrb[2].mxu0  ;;  %v618_v7 = vpop.f32.mrb[2].mxu1  ;;  %v2543_v3 = vld [vmem:[%s3330_s3 + $0x264] ss:$8 sps:$4 sm:$0xff]   ;;  %v2541_v4 = vld [vmem:[%s3330_s3 + $0x260] ss:$8 sps:$4 sm:$0xff]  }
  0xfd   : > { %v498_v8 = vpop.f32.mrb[3].mxu0  ;;  %v619_v9 = vpop.f32.mrb[3].mxu1  ;;  %v2544_v6 = vld [vmem:[%s3330_s3 + $0x270] ss:$8 sps:$4 sm:$0xff]   ;;  %v2549_v7 = vld [vmem:[%s3330_s3 + $0x284] ss:$8 sps:$4 sm:$0xff]  }
  0xfe   : > { %v2547_v8 = vld [vmem:[%s3330_s3 + $0x280] ss:$8 sps:$4 sm:$0xff]   ;;  %v2552_v9 = vld [vmem:[%s3330_s3 + $0x294] ss:$8 sps:$4 sm:$0xff]  }
 0x11a   : > { %v755_v15 = vpop.f32.mrb[4].mxu0 }
 0x11b   : > { %v762_v17 = vadd.f32 %v755_v15, %v615_v1  ;;  %v757_v18 = vpop.f32.mrb[5].mxu0  ;;  %v2538_v1 = vld [vmem:[%s3330_s3 + $0x250] ss:$8 sps:$4 sm:$0xff]   ;;  %v2558_v15 = vld [vmem:[%s3330_s3 + $0x2b4] ss:$8 sps:$4 sm:$0xff]  }
 0x11c   : > { %v763_v19 = vadd.f32 %v757_v18, %v617_v5  ;;  %v759_v20 = vpop.f32.mrb[6].mxu0  ;;  %v2546_v5 = vld [vmem:[%s3330_s3 + $0x274] ss:$8 sps:$4 sm:$0xff]   ;;  %v2559_v18 = vld [vmem:[%s3330_s3 + $0x2c0] ss:$8 sps:$4 sm:$0xff]  }
 0x11d   : > { %v776_v21 = vadd.f32 %v769_v14, %v762_v17  ;;  %v760_v22 = vpop.f32.mrb[7].mxu0  ;;  %v2553_v14 = vld [vmem:[%s3330_s3 + $0x2a0] ss:$8 sps:$4 sm:$0xff]   ;;  %v2561_v17 = vld [vmem:[%s3330_s3 + $0x2c4] ss:$8 sps:$4 sm:$0xff]  }
 0x11e   : > { %v777_v23 = vadd.f32 %v773_v16, %v763_v19  ;;  %v2556_v16 = vld [vmem:[%s3330_s3 + $0x2b0] ss:$8 sps:$4 sm:$0xff]   ;;  %v2564_v19 = vld [vmem:[%s3330_s3 + $0x2d4] ss:$8 sps:$4 sm:$0xff]   ;;  %v2565_v22 = vld [vmem:[%s3330_s3 + $0x2e0] ss:$8 sps:$4 sm:$0xff]  }
 0x11f   : > { %v780_v24 = vmul.f32 0.70710677, %v776_v21  ;;  %v778_v28 = vmul.f32 0.5, %v776_v21  ;;  %v2562_v20 = vld [vmem:[%s3330_s3 + $0x2d0] ss:$8 sps:$4 sm:$0xff]  }
 0x120   : > { %v781_v25 = vmul.f32 0.70710677, %v777_v23  ;;  %v779_v30 = vmul.f32 0.5, %v777_v23  ;;  %v2567_v21 = vld [vmem:[%s3330_s3 + $0x2e4] ss:$8 sps:$4 sm:$0xff]  }
 0x121   : > { %2595 = verf.f32 %v780_v24  ;;  %v2570_v23 = vld [vmem:[%s3330_s3 + $0x2f4] ss:$8 sps:$4 sm:$0xff]   ;;  %v2568_v24 = vld [vmem:[%s3330_s3 + $0x2f0] ss:$8 sps:$4 sm:$0xff]  }
 0x122   : > { %2597 = verf.f32 %v781_v25 }
 0x12b   : > { %v2596_v26 = vpop.eup %2595 }
 0x12c   : > { %v2598_v27 = vpop.eup %2597  ;;  %v784_v29 = vadd.f32 1.0, %v2596_v26  ;;  %v1582_v26 = vld [vmem:[%s3332_s5 + $0x80] sm:$0xff] }
 0x12d   : > { %v785_v31 = vadd.f32 1.0, %v2598_v27  ;;  %v1583_v27 = vld [vmem:[%s3332_s5 + $0x88] sm:$0xff] }
 0x12e   : > { %v786_v32 = vmul.f32 %v784_v29, %v778_v28  ;;  %v1566_v28 = vld [vmem:[%s3332_s5] sm:$0xff]  ;;  %v2313_v29 = vpack.c.bf16 %v1583_v27, %v1582_v26 }
 0x12f   : > { %v787_v33 = vmul.f32 %v785_v31, %v779_v30  ;;  %v1567_v30 = vld [vmem:[%s3332_s5 + $0x8] sm:$0xff]  ;;  %v1585_v31 = vld [vmem:[%s3332_s5 + $0x98] sm:$0xff] }
 0x130   : > { %v799_v34 = vrot.slane %v786_v32, 7  ;;  %v2315_v32 = vpack.c.bf16 %v1567_v30, %v1566_v28  ;;  %2314 = vmatprep.subr.bf16.mxu0 %v2313_v29 }
 0x131   : > { %v800_v35 = vrot.slane %v787_v33, 7 }
 0x132   : > { %803 = vst [vmem:[#allocation2] sm:$0xfe] %v799_v34  ;;  %805 = vst [vmem:[#allocation2 + $0x10] sm:$0x1] %v799_v34  ;;  %v1568_v34 = vld [vmem:[%s3332_s5 + $0x10] sm:$0xff] }
 0x133   : > { %804 = vst [vmem:[#allocation2 + $0x8] sm:$0xfe] %v800_v35  ;;  %806 = vst [vmem:[#allocation2 + $0x18] sm:$0x1] %v800_v35  ;;  %v1569_v35 = vld [vmem:[%s3332_s5 + $0x18] sm:$0xff] }
 0x139   : > { %v807_v36 = vld [vmem:[#allocation2] sm:$0xff]  ;;  %v809_v37 = vld [vmem:[#allocation2 + $0x10] sm:$0x3] }
 0x13a   : > { %v808_v38 = vld [vmem:[#allocation2 + $0x8] sm:$0xff]  ;;  %v810_v39 = vld [vmem:[#allocation2 + $0x18] sm:$0x3]  ;;  %v3049_v41 = vpack.c.bf16 %v809_v37, %v807_v36  ;;  %v811_v44 = vpack.c.bf16 %v807_v36, %v807_v36  ;;  %v1586_v36 = vld [vmem:[%s3332_s5 + $0xa0] sm:$0xff] }
 0x13b   : > { %v812_v42 = vpack.c.bf16 %v808_v38, %v808_v38  ;;  %v814_v43 = vpack.c.bf16 %v810_v39, %v808_v38  ;;  %v1587_v37 = vld [vmem:[%s3332_s5 + $0xa8] sm:$0xff]  ;;  %v2319_v38 = vpack.c.bf16 %v1569_v35, %v1568_v34 }
 0x13c   : > { %v883_v45 = vshll.u32 %v3049_v41, 16  ;;  %v881_v51 = vshrl.u32 %v3049_v41, 16  ;;  %v1333_v25 = vrot.slane %v3049_v41, 1  ;;  %v2321_v39 = vpack.c.bf16 %v1587_v37, %v1586_v36  ;;  %v1570_v41 = vld [vmem:[%s3332_s5 + $0x20] sm:$0xff] }
 0x13d   : > { %1289 = vmatprep.mubr.bf16.mxu0 %v812_v42  ;;  %v890_v46 = vshll.u32 %v814_v43, 16  ;;  %v888_v49 = vshrl.u32 %v814_v43, 16  ;;  %v1334_v56 = vrot.slane %v814_v43, 1  ;;  %v1571_v42 = vld [vmem:[%s3332_s5 + $0x28] sm:$0xff]  ;;  %v1588_v43 = vld [vmem:[%s3332_s5 + $0xb0] sm:$0xff] }
 0x13e   : > { %1290 = vmatmul.mubr.bf16.vlgmr.msra.gmra.mrb[8].mxu0 %v811_v44  ;;  %v885_v48 = vrot.slane %v883_v45, 1  ;;  %v1589_v44 = vld [vmem:[%s3332_s5 + $0xb8] sm:$0xff]  ;;  %v2323_v45 = vpack.c.bf16 %v1571_v42, %v1570_v41 }
 0x13f   : > { %v892_v50 = vrot.slane %v890_v46, 1  ;;  %2316 = vmatpush3.bf16.msra.mxu0 %v2315_v32  ;;  %v2325_v46 = vpack.c.bf16 %v1589_v44, %v1588_v43 }
 0x140   : > { %v886_v54 = vor.u32 %v885_v48, %v881_v51  ;;  %v1572_v48 = vld [vmem:[%s3332_s5 + $0x30] sm:$0xff]  ;;  %v1590_v51 = vld [vmem:[%s3332_s5 + $0xc0] sm:$0xff] }
 0x141   : > { %v893_v52 = vor.u32 %v892_v50, %v888_v49  ;;  %v1573_v49 = vld [vmem:[%s3332_s5 + $0x38] sm:$0xff] }
 0x142   : > { %v2327_v50 = vpack.c.bf16 %v1573_v49, %v1572_v48  ;;  %v2573_v48 = vld [vmem:[%s3334_s7 + $0x4] ss:$8 sps:$4 sm:$0xff]   ;;  %v2571_v49 = vld [vmem:[%s3334_s7] ss:$8 sps:$4 sm:$0xff]  }
 0x143   : > { %1088 = vmatprep.mubr.bf16.mxu1 %v893_v52  ;;  %v1591_v52 = vld [vmem:[%s3332_s5 + $0xc8] sm:$0xff] }
 0x144   : > { %1089 = vmatmul.mubr.bf16.vlgmr.msra.gmra.mrb[4].mxu1 %v886_v54  ;;  %v1574_v54 = vld [vmem:[%s3332_s5 + $0x40] sm:$0xff] }
 0x145   : > { %1498 = vmatpush1.bf16.msra.mxu1 %v2523_v53  ;;  %1529 = vmatprep.mubr.bf16.mxu1 %v1334_v56  ;;  %v2329_v53 = vpack.c.bf16 %v1591_v52, %v1590_v51  ;;  %v2576_v51 = vld [vmem:[%s3334_s7 + $0x14] ss:$8 sps:$4 sm:$0xff]  }
 0x146   : > { %1499 = vmatprep.subr.bf16.mxu1 %v2528_v55  ;;  %v1575_v55 = vld [vmem:[%s3332_s5 + $0x48] sm:$0xff] }
 0x147   : > { %v2331_v56 = vpack.c.bf16 %v1575_v55, %v1574_v54  ;;  %v2577_v54 = vld [vmem:[%s3334_s7 + $0x20] ss:$8 sps:$4 sm:$0xff]   ;;  %v2582_v55 = vld [vmem:[%s3334_s7 + $0x34] ss:$8 sps:$4 sm:$0xff]  }
 0x149   : > { %1500 = vmatpush1.bf16.msra.mxu1 %v2526_v57  ;;  %v1592_v57 = vld [vmem:[%s3332_s5 + $0xd0] sm:$0xff] }
 0x14a   : > { %1501 = vmatprep.subr.bf16.mxu1 %v2531_v58  ;;  %v1593_v58 = vld [vmem:[%s3332_s5 + $0xd8] sm:$0xff] }
 0x14d   : > { %1502 = vmatpush1.bf16.msra.mxu1 %v2529_v59  ;;  %v2333_v59 = vpack.c.bf16 %v1593_v58, %v1592_v57  ;;  %v2585_v57 = vld [vmem:[%s3334_s7 + $0x44] ss:$8 sps:$4 sm:$0xff]   ;;  %v2583_v58 = vld [vmem:[%s3334_s7 + $0x40] ss:$8 sps:$4 sm:$0xff]  }
 0x14e   : > { %1503 = vmatprep.subr.bf16.mxu1 %v2534_v60  ;;  %v1576_v60 = vld [vmem:[%s3332_s5 + $0x50] sm:$0xff] }
 0x151   : > { %1504 = vmatpush1.bf16.msra.mxu1 %v2532_v61  ;;  %v1577_v61 = vld [vmem:[%s3332_s5 + $0x58] sm:$0xff] }
 0x152   : > { %1505 = vmatprep.subr.bf16.mxu1 %v2537_v62  ;;  %v2335_v62 = vpack.c.bf16 %v1577_v61, %v1576_v60  ;;  %v2586_v60 = vld [vmem:[%s3334_s7 + $0x50] ss:$8 sps:$4 sm:$0xff]   ;;  %v2591_v61 = vld [vmem:[%s3334_s7 + $0x64] ss:$8 sps:$4 sm:$0xff]  }
 0x155   : > { %1506 = vmatpush1.bf16.msra.mxu1 %v2535_v63  ;;  %v1594_v63 = vld [vmem:[%s3332_s5 + $0xe0] sm:$0xff] }
 0x156   : > { %1507 = vmatprep.subr.bf16.mxu1 %v2540_v0  ;;  %v1595_v0 = vld [vmem:[%s3332_s5 + $0xe8] sm:$0xff] }
 0x159   : > { %1508 = vmatpush1.bf16.msra.mxu1 %v2538_v1  ;;  %v2337_v1 = vpack.c.bf16 %v1595_v0, %v1594_v63  ;;  %v2594_v63 = vld [vmem:[%s3334_s7 + $0x74] ss:$8 sps:$4 sm:$0xff]   ;;  %v2592_v0 = vld [vmem:[%s3334_s7 + $0x70] ss:$8 sps:$4 sm:$0xff]  }
 0x15a   : > { %1509 = vmatprep.subr.bf16.mxu1 %v2543_v3  ;;  %v1578_v3 = vld [vmem:[%s3332_s5 + $0x60] sm:$0xff] }
 0x15d   : > { %1510 = vmatpush1.bf16.msra.mxu1 %v2541_v4  ;;  %v1579_v4 = vld [vmem:[%s3332_s5 + $0x68] sm:$0xff] }
 0x15e   : > { %1511 = vmatprep.subr.bf16.mxu1 %v2546_v5  ;;  %v2339_v5 = vpack.c.bf16 %v1579_v4, %v1578_v3 }
 0x161   : > { %1512 = vmatpush1.bf16.msra.mxu1 %v2544_v6  ;;  %v1596_v6 = vld [vmem:[%s3332_s5 + $0xf0] sm:$0xff] }
 0x162   : > { %1513 = vmatprep.subr.bf16.mxu1 %v2549_v7  ;;  %v1597_v7 = vld [vmem:[%s3332_s5 + $0xf8] sm:$0xff] }
 0x165   : > { %1514 = vmatpush1.bf16.msra.mxu1 %v2547_v8  ;;  %v1580_v8 = vld [vmem:[%s3332_s5 + $0x70] sm:$0xff] }
 0x166   : > { %1515 = vmatprep.subr.bf16.mxu1 %v2552_v9  ;;  %v2341_v9 = vpack.c.bf16 %v1597_v7, %v1596_v6 }
 0x169   : > { %1516 = vmatpush1.bf16.msra.mxu1 %v2550_v10  ;;  %v1581_v10 = vld [vmem:[%s3332_s5 + $0x78] sm:$0xff] }
 0x16a   : > { %1517 = vmatprep.subr.bf16.mxu1 %v2555_v12  ;;  %v2343_v12 = vpack.c.bf16 %v1581_v10, %v1580_v8 }
 0x16d   : > { %1518 = vmatpush1.bf16.msra.mxu1 %v2553_v14 }
 0x16e   : > { %1519 = vmatprep.subr.bf16.mxu1 %v2558_v15 }
 0x171   : > { %1520 = vmatpush1.bf16.msra.mxu1 %v2556_v16 }
 0x172   : > { %1521 = vmatprep.subr.bf16.mxu1 %v2561_v17 }
 0x175   : > { %1522 = vmatpush1.bf16.msra.mxu1 %v2559_v18 }
 0x176   : > { %1523 = vmatprep.subr.bf16.mxu1 %v2564_v19 }
 0x179   : > { %1524 = vmatpush1.bf16.msra.mxu1 %v2562_v20 }
 0x17a   : > { %1525 = vmatprep.subr.bf16.mxu1 %v2567_v21 }
 0x17d   : > { %1526 = vmatpush1.bf16.msra.mxu1 %v2565_v22 }
 0x17e   : > { %1527 = vmatprep.subr.bf16.mxu1 %v2570_v23 }
 0x181   : > { %1528 = vmatpush1.bf16.msra.mxu1 %v2568_v24  ;;  %v1540_v24 = vld [vmem:[%s3331_s4] sm:$0x3] }
 0x182   : > { %v1549_v27 = vrot.slane %v1540_v24, %v3045_v13  ;;  %1893 = vmatprep.subr.bf16.mxu1 %v2573_v48 }
 0x184   : > { %1530 = vmatmul.mubr.bf16.vlgmr.msra.gmra.mrb[8].mxu1 %v1333_v25  ;;  %v1545_v25 = vrot.slane %v1540_v24, %v3040_v11 }
 0x185   : > { %1925 = vmatprep.mubr.bf16.mxu1 %v2621_v2  ;;  %v1584_v2 = vld [vmem:[%s3332_s5 + $0x90] sm:$0xff]  ;;  %1894 = vmatpush1.bf16.msra.mxu1 %v2571_v49 }
 0x186   : > { %v2317_v33 = vpack.c.bf16 %v1585_v31, %v1584_v2  ;;  %1895 = vmatprep.subr.bf16.mxu1 %v2576_v51 }
 0x188   : > { %2318 = vmatprep.subr.bf16.mxu0 %v2317_v33 }
 0x189   : > { %2320 = vmatpush3.bf16.msra.mxu0 %v2319_v38 }
 0x18a   : > { %2322 = vmatprep.subr.bf16.mxu0 %v2321_v39 }
 0x18d   : > { %2324 = vmatpush3.bf16.msra.mxu0 %v2323_v45 }
 0x18e   : > { %2326 = vmatprep.subr.bf16.mxu0 %v2325_v46 }
 0x191   : > { %2328 = vmatpush3.bf16.msra.mxu0 %v2327_v50  ;;  %v2252_v50 = vld.sshfl [vmem:[%s3333_s6] sm:$0x33 pattern:$0x76325410] }
 0x192   : > { %2330 = vmatprep.subr.bf16.mxu0 %v2329_v53  ;;  %v1682_v52 = vcombine.high %v2252_v50, %v2252_v50  ;;  %v2579_v53 = vld [vmem:[%s3334_s7 + $0x24] ss:$8 sps:$4 sm:$0xff]  }
 0x195   : > { %2332 = vmatpush3.bf16.msra.mxu0 %v2331_v56  ;;  %v2580_v56 = vld [vmem:[%s3334_s7 + $0x30] ss:$8 sps:$4 sm:$0xff]  }
 0x196   : > { %2334 = vmatprep.subr.bf16.mxu0 %v2333_v59  ;;  %v2588_v59 = vld [vmem:[%s3334_s7 + $0x54] ss:$8 sps:$4 sm:$0xff]  }
 0x199   : > { %2336 = vmatpush3.bf16.msra.mxu0 %v2335_v62  ;;  %v2589_v62 = vld [vmem:[%s3334_s7 + $0x60] ss:$8 sps:$4 sm:$0xff]  }
 0x19a   : > { %2338 = vmatprep.subr.bf16.mxu0 %v2337_v1 }
 0x19d   : > { %2340 = vmatpush3.bf16.msra.mxu0 %v2339_v5 }
 0x19e   : > { %2342 = vmatprep.subr.bf16.mxu0 %v2341_v9 }
 0x1a1   : > { %2344 = vmatpush3.bf16.msra.mxu0 %v2343_v12 }
 0x1a2   : > { %2253 = vmatprep.subr.msk.mxu0 %vm1687_vm1, %v1682_v52 }
 0x211   : > { %v1291_v14 = vpop.f32.mrb[8].mxu0 }
 0x212   : > { %v1293_v15 = vpop.f32.mrb[9].mxu0 }
 0x213   : > { %v1295_v16 = vpop.f32.mrb[10].mxu0 }
 0x214   : > { %v1296_v17 = vpop.f32.mrb[11].mxu0 }
 0x217   : > { %v1090_v18 = vpop.f32.mrb[4].mxu1 }
 0x218   : > { %v1292_v19 = vadd.f32 %v1291_v14, %v1090_v18  ;;  %v1092_v20 = vpop.f32.mrb[5].mxu1 }
 0x219   : > { %v1294_v21 = vadd.f32 %v1293_v15, %v1092_v20  ;;  %v1094_v22 = vpop.f32.mrb[6].mxu1 }
 0x21a   : > { %v1095_v23 = vpop.f32.mrb[7].mxu1 }
 0x21b   : > { %v1801_v23 = vld [vmem:[%s3335_s8] sm:$0x3] }
 0x21c   : > { %v1806_v24 = vrot.slane %v1801_v23, %v3040_v11 }
 0x257   : > { %v1531_v26 = vpop.f32.mrb[8].mxu1 }
 0x258   : > { %v1538_v28 = vadd.f32 %v1531_v26, %v1292_v19  ;;  %v1533_v29 = vpop.f32.mrb[9].mxu1 }
 0x259   : > { %v1539_v30 = vadd.f32 %v1533_v29, %v1294_v21  ;;  %v1535_v2 = vpop.f32.mrb[10].mxu1 }
 0x25a   : > { %v3249_v31 = vadd.f32 %v1545_v25, %v1538_v28  ;;  %v1536_v32 = vpop.f32.mrb[11].mxu1  ;;  %v1810_v25 = vrot.slane %v1801_v23, %v3045_v13 }
 0x25b   : > { %v3251_v33 = vadd.f32 %v1549_v27, %v1539_v30 }
 0x25c   : > { %v1554_v34 = vrot.slane %v3249_v31, 4 }
 0x25d   : > { %v1560_v35 = vrot.slane %v3251_v33, 4 }
 0x25e   : > { %v1555_v36 = vadd.f32 %v1554_v34, %v3249_v31 }
 0x25f   : > { %v1561_v37 = vadd.f32 %v1560_v35, %v3251_v33 }
 0x260   : > { %v1556_v38 = vrot.slane %v1555_v36, 2 }
 0x261   : > { %v1562_v39 = vrot.slane %v1561_v37, 2 }
 0x262   : > { %v1557_v41 = vadd.f32 %v1556_v38, %v1555_v36 }
 0x263   : > { %v1563_v42 = vadd.f32 %v1562_v39, %v1561_v37 }
 0x264   : > { %v1558_v43 = vrot.slane %v1557_v41, 1 }
 0x265   : > { %v1564_v44 = vrot.slane %v1563_v42, 1 }
 0x266   : > { %v1559_v46 = vadd.f32 %v1558_v43, %v1557_v41 }
 0x267   : > { %v1565_v45 = vadd.f32 %v1564_v44, %v1563_v42 }
 0x269   : > { %1662 = vmatprep.mubr.f32.mxu0 %v1565_v45 }
 0x26a   : > { %1663 = vmatmul.mubr.f32.vlgmr.msra.gmra.mrb[12].mxu0 %v1559_v46 }
 0x26b   : > { %1756 = vmatprep.mubr.f32.mxu0 %v2622_v47  ;;  %v2574_v47 = vld [vmem:[%s3334_s7 + $0x10] ss:$8 sps:$4 sm:$0xff]   ;;  %2254 = vmatpush1.msk.msra.mxu0 %vm1687_vm1, %v2252_v50 }
 0x26c   : > { %1896 = vmatpush1.bf16.msra.mxu1 %v2574_v47 }
 0x26d   : > { %1897 = vmatprep.subr.bf16.mxu1 %v2579_v53 }
 0x270   : > { %1898 = vmatpush1.bf16.msra.mxu1 %v2577_v54 }
 0x271   : > { %1899 = vmatprep.subr.bf16.mxu1 %v2582_v55 }
 0x274   : > { %1900 = vmatpush1.bf16.msra.mxu1 %v2580_v56 }
 0x275   : > { %1901 = vmatprep.subr.bf16.mxu1 %v2585_v57 }
 0x278   : > { %1902 = vmatpush1.bf16.msra.mxu1 %v2583_v58 }
 0x279   : > { %1903 = vmatprep.subr.bf16.mxu1 %v2588_v59 }
 0x27c   : > { %1904 = vmatpush1.bf16.msra.mxu1 %v2586_v60 }
 0x27d   : > { %1905 = vmatprep.subr.bf16.mxu1 %v2591_v61 }
 0x280   : > { %1906 = vmatpush1.bf16.msra.mxu1 %v2589_v62 }
 0x281   : > { %1907 = vmatprep.subr.bf16.mxu1 %v2594_v63 }
 0x284   : > { %1908 = vmatpush1.bf16.msra.mxu1 %v2592_v0 }
 0x287   : > { %1926 = vmatmul.mubr.bf16.vlgmr.msra.gmra.mrb[12].mxu1 %v2794_v40 }
 0x33d   : > { %v2310_v1 = vpop.f32.mrb[12].mxu0 }
 0x33e   : > { %v2311_v3 = vpop.f32.mrb[13].mxu0 }
 0x33f   : > { %v2312_v4 = vadd.f32 %v2311_v3, %v2310_v1 }
 0x341   : > { %v1669_v5 = vmul.f32 0.70710677, %v2312_v4  ;;  %v1668_v7 = vmul.f32 0.5, %v2312_v4 }
 0x343   : > { %2599 = verf.f32 %v1669_v5 }
 0x34d   : > { %v2600_v6 = vpop.eup %2599 }
 0x34e   : > { %v1671_v8 = vadd.f32 1.0, %v2600_v6 }
 0x350   : > { %v1672_v9 = vmul.f32 %v1671_v8, %v1668_v7 }
 0x352   : > { %2255 = vmatmul.mubr.msk.f32.vlgmr.msra.gmra.mrb[14].mxu0 %vm1683_vm2, %v1672_v9 }
 0x35a   : > { %v1927_v10 = vpop.f32.mrb[12].mxu1 }
 0x35b   : > { %v1929_v12 = vpop.f32.mrb[13].mxu1  ;;  %v1928_v29 = vadd.f32 %v1927_v10, %v1806_v24 }
 0x35c   : > { %v1931_v14 = vpop.f32.mrb[14].mxu1  ;;  %v1930_v2 = vadd.f32 %v1929_v12, %v1810_v25 }
 0x35d   : > { %v1932_v15 = vpop.f32.mrb[15].mxu1 }
 0x425   : > { %v1758_v16 = vpop.f32.mrb[14].mxu0 }
 0x426   : > { %v2256_v17 = vmul.f32 -1.442695, %v1758_v16  ;;  %v1760_v18 = vpop.f32.mrb[15].mxu0 }
 0x427   : > { %v2257_v19 = vmul.f32 -1.442695, %v1760_v18 }
 0x428   : > { %2601 = vpow2.f32 %v2256_v17 }
 0x429   : > { %2603 = vpow2.f32 %v2257_v19 }
 0x432   : > { %v2602_v40 = vpop.eup %2601 }
 0x433   : > { %v2604_v20 = vpop.eup %2603  ;;  %v1769_v21 = vadd.f32 1.0, %v2602_v40 }
 0x434   : > { %v1770_v22 = vadd.f32 1.0, %v2604_v20 }
 0x435   : > { %2605 = vrcp.f32 %v1769_v21 }
 0x436   : > { %2607 = vrcp.f32 %v1770_v22 }
 0x43f   : > { %v2606_v26 = vpop.eup %2605 }
 0x440   : > { %v2608_v27 = vpop.eup %2607  ;;  %v1778_v28 = vrot.slane %v2606_v26, %v3040_v11 }
 0x441   : > { %v1782_v30 = vrot.slane %v2608_v27, %v3040_v11 }
 0x442   : > { %v1783_v32 = vmul.f32 %v1778_v28, %v3249_v31 }
 0x443   : > { %v1784_v34 = vmul.f32 %v1782_v30, %v3251_v33 }
 0x444   : > { %v1934_v35 = vadd.f32 %v1928_v29, %v1783_v32 }
 0x445   : > { %v1935_v36 = vadd.f32 %v1930_v2, %v1784_v34 }
 0x446   : > { %v1938_v37 = vmul.f32 0.70710677, %v1934_v35  ;;  %v1936_v41 = vmul.f32 0.5, %v1934_v35 }
 0x447   : > { %v1939_v38 = vmul.f32 0.70710677, %v1935_v36  ;;  %v1937_v11 = vmul.f32 0.5, %v1935_v36 }
 0x448   : > { %2609 = verf.f32 %v1938_v37 }
 0x449   : > { %2611 = verf.f32 %v1939_v38 }
 0x452   : > { %v2610_v13 = vpop.eup %2609 }
 0x453   : > { %v2612_v39 = vpop.eup %2611  ;;  %v1942_v42 = vadd.f32 1.0, %v2610_v13 }
 0x454   : > { %v1943_v43 = vadd.f32 1.0, %v2612_v39 }
 0x455   : > { %v1944_v31 = vmul.f32 %v1942_v42, %v1936_v41 }
 0x456   : > { %v1945_v44 = vmul.f32 %v1943_v43, %v1937_v11 }
 0x457   : > { %1946 = vst [vmem:[%s332_s29] sm:$0xff] %v1944_v31 }
 0x458   : > { %1947 = vst [vmem:[%s332_s29 + $0x8] sm:$0xff] %v1945_v44 }
 0x459 PF: > { %s19_s30 = sadd.s32 1, %s2619_s30  }
 0x45a   : > { %p16_p4 = scmp.ge.s32.totalorder %s19_s30, 4  }
 0x45c   :  { %18 = sbr.rel (!%p16_p4) target bundleno = 1 (0x1), region = 91 }

</bundles_post_ra>
